<compile_context>
chip_gen: v7x
topology: tpu7x:2x2x1
jax: 0.10.0
libtpu: 0.0.40
codegen_flags: <defaults>
</compile_context>

<pallas_src>
import functools
import numpy as np
import jax
import jax.numpy as jnp
from jax.experimental import pallas as pl
from jax.experimental.pallas import tpu as pltpu


# ------------------------------ helpers ---------------------------------------
def _round_up(v, m):
    return ((v + m - 1) // m) * m


def _pad_gate_cols(w, d, dp):
    """(rows, 3*d) packed [r|z|n] -> (rows, 3*dp): each gate's d real lanes
    start at a 128-aligned boundary g*dp; padding lanes are zero."""
    if dp == d:
        return w
    rows = w.shape[0]
    zeros = jnp.zeros((rows, dp - d), w.dtype)
    return jnp.concatenate(
        [jnp.concatenate([w[:, g * d:(g + 1) * d], zeros], axis=1)
         for g in range(3)], axis=1)


def _pad_rows(w, dp):
    """Pad the leading (contraction) dim with zero rows up to dp."""
    rows = w.shape[0]
    if rows == dp:
        return w
    return jnp.concatenate([w, jnp.zeros((dp - rows, w.shape[1]), w.dtype)], 0)


def _pad_cols(w, dp):
    """Pad the trailing dim with zero lanes up to dp."""
    cols = w.shape[1]
    if cols == dp:
        return w
    return jnp.concatenate([w, jnp.zeros((w.shape[0], dp - cols), w.dtype)], 1)


def _pick_tile_b(B, C, single, target_rows=512):
    """Batches per grid step.  Rows per step = TILE_B * C.  When the grid has
    more than one step, Mosaic block rules need the blocked sublane dims to be
    multiples of 8 (and TILE_B itself for the single-path (TILE_B, pred_len)
    output).  Falls back to a single full-array tile when nothing divides."""
    best = None
    for tb in range(1, B):
        if B % tb:
            continue
        if (tb * C) % 8 or (single and tb % 8):
            continue
        if tb * C > target_rows:
            break
        best = tb
    return best if best is not None else B


# ------------------------------ fused kernel ----------------------------------
def _seg_gru_kernel(xw_ref, wp_ref, bp_ref,
                    wih_e_ref, whh_e_ref, bih_e_ref, bhn_e_ref,
                    gi_dec_ref, whh_d_ref, bhn_d_ref,
                    wre_ref, bre_ref, wdr_ref, bdr_ref,
                    out_ref, *, M, C, single):
    f32 = jnp.float32
    N, R, W = xw_ref.shape                 # R = TILE_B * C rows this grid step
    DP = bp_ref.shape[-1]                  # lane-padded hidden width (>= d_model)
    TB = R // C

    def gru_step(gi, h, whh, bhn):
        # PyTorch GRU cell; gates packed [r|z|n], each DP lanes wide so the
        # slices land on vreg lane boundaries.  r/z input+hidden biases are
        # already folded into gi; b_hn stays inside the r-gated term.
        gh = jnp.dot(h, whh, preferred_element_type=f32)
        r = jax.nn.sigmoid(gi[:, 0:DP] + gh[:, 0:DP])
        z = jax.nn.sigmoid(gi[:, DP:2 * DP] + gh[:, DP:2 * DP])
        n = jnp.tanh(gi[:, 2 * DP:3 * DP] + r * (gh[:, 2 * DP:3 * DP] + bhn))
        return (1.0 - z) * n + z * h

    # ---- encoder: hoisted input-to-hidden path (two large matmuls) ----------
    xw = xw_ref[...].reshape(N * R, W)                     # (N*R, W)
    xd = jnp.maximum(
        jnp.dot(xw, wp_ref[...], preferred_element_type=f32) + bp_ref[...],
        0.0)                                               # (N*R, DP)
    gi_all = (jnp.dot(xd, wih_e_ref[...], preferred_element_type=f32)
              + bih_e_ref[...])                            # (N*R, 3*DP)

    whh_e = whh_e_ref[...]
    bhn_e = jnp.broadcast_to(bhn_e_ref[...], (R, DP))      # hoisted broadcast

    h = jnp.zeros((R, DP), f32)
    if N <= 8:                             # small static N -> unrolled
        for t in range(N):
            h = gru_step(gi_all[t * R:(t + 1) * R, :], h, whh_e, bhn_e)
    else:                                  # keep vreg live ranges flat at big N
        gi3 = gi_all.reshape(N, R, 3 * DP)
        h = jax.lax.fori_loop(
            0, N, lambda t, hh: gru_step(gi3[t], hh, whh_e, bhn_e), h)

    # ---- decoder: one GRU step over M*R rows (row = m*R + b_local*C + c) ----
    h0 = jnp.broadcast_to(h[None], (M, R, DP)).reshape(M * R, DP)
    gi_dec = jnp.broadcast_to(gi_dec_ref[...][:, None, :, :],
                              (M, TB, C, 3 * DP)).reshape(M * R, 3 * DP)
    h1 = gru_step(gi_dec, h0, whh_d_ref[...], bhn_d_ref[...])
    # dropout == identity at inference time

    # ---- linear_patch_re, emitted lane-dense as (rows, pred_len) ------------
    yw_all = (jnp.dot(h1, wre_ref[...], preferred_element_type=f32)
              + bre_ref[...])                              # (M*R, W)
    yw = jnp.concatenate([yw_all[m * R:(m + 1) * R, :] for m in range(M)],
                         axis=1)                           # (R, M*W)
    if single:
        # linear_patch_dr: wdr-weighted reduction over the C channel rows.
        y = (jnp.sum(yw.reshape(TB, C, M * W) * wdr_ref[...], axis=1)
             + bdr_ref[...])
        out_ref[...] = jnp.maximum(y, 0.0)                 # (TB, pred_len)
    else:
        out_ref[...] = jnp.maximum(yw, 0.0)                # (R, pred_len)


# --------------------------------- wrapper -------------------------------------
def seg_gru_forward(params, configs, x, x_mark=None, y_mark=None,
                    output_channel='single'):
    del x_mark, y_mark                     # unused (same as the PyTorch forward)
    B, L, C = x.shape
    W = configs['patch_len']
    d = configs['d_model']
    N = configs['seq_len'] // W
    M = configs['pred_len'] // W
    P = configs['pred_len']
    dh = d // 2
    single = (output_channel == 'single')
    DP = _round_up(d, 128)                 # lane-aligned hidden width

    # patching (single transpose): xw_t[n, b*C + c, :] = x[b, n*W:(n+1)*W, c]
    xw_t = jnp.transpose(x.reshape(B, N, W, C), (1, 0, 3, 2)).reshape(N, B * C, W)

    # ---- parameter layout prep (tiny, traced once) ---------------------------
    wp_p = _pad_cols(params['wp'], DP)                       # (W, DP)
    bp_p = _pad_cols(params['bp'], DP)                       # (1, DP)

    wih_e_p = _pad_rows(_pad_gate_cols(params['wih_e'], d, DP), DP)   # (DP, 3DP)
    whh_e_p = _pad_rows(_pad_gate_cols(params['whh_e'], d, DP), DP)   # (DP, 3DP)
    bih_e_c = params['bih_e'].at[:, :2 * d].add(params['bhh_e'][:, :2 * d])
    bih_e_p = _pad_gate_cols(bih_e_c, d, DP)                 # (1, 3DP), r/z combined
    bhn_e_p = _pad_cols(params['bhh_e'][:, 2 * d:], DP)      # (1, DP)

    # decoder input-to-hidden path is data-independent -> precompute gi_dec
    dec_small = jnp.concatenate(
        [jnp.broadcast_to(params['pos_emb'][:, None, :], (M, C, dh)),
         jnp.broadcast_to(params['channel_emb'][None, :, :], (M, C, dh))],
        axis=-1)                                             # (M, C, d) [pos|chan]
    gi_dec = dec_small.reshape(M * C, d) @ params['wih_d'] + params['bih_d']
    gi_dec = gi_dec.at[:, :2 * d].add(params['bhh_d'][:, :2 * d])
    gi_dec_p = _pad_gate_cols(gi_dec, d, DP).reshape(M, C, 3 * DP)

    whh_d_p = _pad_rows(_pad_gate_cols(params['whh_d'], d, DP), DP)   # (DP, 3DP)
    bhn_d_p = _pad_cols(params['bhh_d'][:, 2 * d:], DP)      # (1, DP)

    wre_p = _pad_rows(params['wre'], DP)                     # (DP, W)
    bre = params['bre']                                      # (1, W)
    wdr3 = params['wdr'].reshape(1, C, 1)                    # (1, C, 1)
    bdr = params['bdr']                                      # (1, 1)

    # ---- grid over batch groups; weights stay VMEM-resident ------------------
    TILE_B = _pick_tile_b(B, C, single)
    TILE_R = TILE_B * C
    grid = (B // TILE_B,)

    def _const_spec(a):
        nd = a.ndim
        return pl.BlockSpec(a.shape, lambda i, _nd=nd: (0,) * _nd)

    weights = (wp_p, bp_p, wih_e_p, whh_e_p, bih_e_p, bhn_e_p,
               gi_dec_p, whh_d_p, bhn_d_p, wre_p, bre, wdr3, bdr)
    in_specs = ([pl.BlockSpec((N, TILE_R, W), lambda i: (0, i, 0))]
                + [_const_spec(w) for w in weights])

    if single:
        out_shape = jax.ShapeDtypeStruct((B, P), jnp.float32)
        out_spec = pl.BlockSpec((TILE_B, P), lambda i: (i, 0))
    else:
        out_shape = jax.ShapeDtypeStruct((B * C, P), jnp.float32)
        out_spec = pl.BlockSpec((TILE_R, P), lambda i: (i, 0))

    kernel = functools.partial(_seg_gru_kernel, M=M, C=C, single=single)
    out = pl.pallas_call(
        kernel,
        out_shape=out_shape,
        grid=grid,
        in_specs=in_specs,
        out_specs=out_spec,
        compiler_params=pltpu.CompilerParams(
            dimension_semantics=("parallel",)),
    )(xw_t, *weights)

    if single:
        return out                                           # (B, pred_len)
    return jnp.transpose(out.reshape(B, C, P), (0, 2, 1))    # (B, pred_len, C)


# --------------------------- pure-JAX reference --------------------------------
def _gru_cell_ref(x, h, wih, whh, bih, bhh, d):
    gi = x @ wih + bih
    gh = h @ whh + bhh
    r = jax.nn.sigmoid(gi[:, :d] + gh[:, :d])
    z = jax.nn.sigmoid(gi[:, d:2 * d] + gh[:, d:2 * d])
    n = jnp.tanh(gi[:, 2 * d:] + r * gh[:, 2 * d:])
    return (1.0 - z) * n + z * h


def seg_gru_ref(params, configs, x, output_channel='single'):
    # Mirrors the PyTorch graph (including its row ordering).
    B, L, C = x.shape
    W = configs['patch_len']; d = configs['d_model']
    N = configs['seq_len'] // W; M = configs['pred_len'] // W
    pred_len = configs['pred_len']; BC = B * C
    xw = jnp.transpose(x, (0, 2, 1)).reshape(BC, N, W)
    h = jnp.zeros((BC, d), jnp.float32)
    for t in range(N):
        xd = jnp.maximum(xw[:, t, :] @ params['wp'] + params['bp'], 0.0)
        h = _gru_cell_ref(xd, h, params['wih_e'], params['whh_e'],
                          params['bih_e'], params['bhh_e'], d)
    h0 = jnp.repeat(h, M, axis=0)                                # (BC*M, d)
    pos = jnp.broadcast_to(params['pos_emb'][None], (BC, M, d // 2))
    chan = jnp.broadcast_to(params['channel_emb'][None, :, None, :],
                            (B, C, M, d // 2)).reshape(BC, M, d // 2)
    dec_in = jnp.concatenate([pos, chan], axis=-1).reshape(BC * M, d)
    h1 = _gru_cell_ref(dec_in, h0, params['wih_d'], params['whh_d'],
                       params['bih_d'], params['bhh_d'], d)
    yw = h1 @ params['wre'] + params['bre']                      # (BC*M, W)
    y = yw.reshape(B, C, M * W).transpose(0, 2, 1)               # (B, pred, C)
    if output_channel == 'single':
        y = (y.reshape(B * pred_len, C) @ params['wdr']
             + params['bdr']).reshape(B, pred_len)
    return jnp.maximum(y, 0.0)


# ---------------------------------- params -------------------------------------
def init_params(key, configs):
    W = configs['patch_len']; d = configs['d_model']
    C = configs['enc_in']; M = configs['pred_len'] // W
    ks = jax.random.split(key, 16)

    def unif(k, shape, fan_in):
        b = 1.0 / np.sqrt(fan_in)
        return jax.random.uniform(k, shape, jnp.float32, -b, b)

    return {
        # linear_patch: patch_len -> d_model   (stored (in, out))
        'wp': unif(ks[0], (W, d), W),
        'bp': unif(ks[1], (1, d), W),
        # GRU encoder: gates packed along columns in PyTorch order [r | z | n]
        'wih_e': unif(ks[2], (d, 3 * d), d),
        'whh_e': unif(ks[3], (d, 3 * d), d),
        'bih_e': unif(ks[4], (1, 3 * d), d),
        'bhh_e': unif(ks[5], (1, 3 * d), d),
        # GRU decoder
        'wih_d': unif(ks[6], (d, 3 * d), d),
        'whh_d': unif(ks[7], (d, 3 * d), d),
        'bih_d': unif(ks[8], (1, 3 * d), d),
        'bhh_d': unif(ks[9], (1, 3 * d), d),
        # linear_patch_re: d_model -> patch_len
        'wre': unif(ks[10], (d, W), d),
        'bre': unif(ks[11], (1, W), d),
        # embeddings (torch.randn)
        'pos_emb': jax.random.normal(ks[12], (M, d // 2), jnp.float32),
        'channel_emb': jax.random.normal(ks[13], (C, d // 2), jnp.float32),
        # linear_patch_dr: enc_in -> 1
        'wdr': unif(ks[14], (C, 1), C),
        'bdr': unif(ks[15], (1, 1), C),
    }


# ----------------------------------- main ---------------------------------------
if __name__ == "__main__":
    configs = dict(seq_len=16, pred_len=8, enc_in=4, patch_len=4,
                   d_model=32, dropout=0.1)
    B = 2
    key = jax.random.PRNGKey(0)
    pkey, xkey = jax.random.split(key)
    params = init_params(pkey, configs)

    x = jax.random.normal(xkey, (B, configs['seq_len'], configs['enc_in']),
                          jnp.float32)
    x_mark = jnp.zeros((B, configs['seq_len'], 1), jnp.float32)   # unused
    y_mark = jnp.zeros((B, configs['pred_len'], 1), jnp.float32)  # unused

    # -- 'single' output channel (main path) --
    out = seg_gru_forward(params, configs, x, x_mark, y_mark,
                          output_channel='single')
    out = jax.block_until_ready(out)
    ref = seg_gru_ref(params, configs, x, output_channel='single')
    assert out.shape == (B, configs['pred_len'])
    np.testing.assert_allclose(np.asarray(out), np.asarray(ref),
                               rtol=5e-2, atol=5e-2)

    # -- multi-channel output path --
    out_m = seg_gru_forward(params, configs, x, x_mark, y_mark,
                            output_channel='multi')
    out_m = jax.block_until_ready(out_m)
    ref_m = seg_gru_ref(params, configs, x, output_channel='multi')
    assert out_m.shape == (B, configs['pred_len'], configs['enc_in'])
    np.testing.assert_allclose(np.asarray(out_m), np.asarray(ref_m),
                               rtol=5e-2, atol=5e-2)

    print("KERNEL_OK")
</pallas_src>

<mosaic_0001>
module attributes {stable_mosaic.version = 11 : i64} {
  func.func @_seg_gru_kernel(%arg0: i32, %arg1: memref<4x8x4xf32, #tpu.memory_space<vmem>>, %arg2: memref<4x128xf32, #tpu.memory_space<vmem>>, %arg3: memref<1x128xf32, #tpu.memory_space<vmem>>, %arg4: memref<128x384xf32, #tpu.memory_space<vmem>>, %arg5: memref<128x384xf32, #tpu.memory_space<vmem>>, %arg6: memref<1x384xf32, #tpu.memory_space<vmem>>, %arg7: memref<1x128xf32, #tpu.memory_space<vmem>>, %arg8: memref<2x4x384xf32, #tpu.memory_space<vmem>>, %arg9: memref<128x384xf32, #tpu.memory_space<vmem>>, %arg10: memref<1x128xf32, #tpu.memory_space<vmem>>, %arg11: memref<128x4xf32, #tpu.memory_space<vmem>>, %arg12: memref<1x4xf32, #tpu.memory_space<vmem>>, %arg13: memref<1x4x1xf32, #tpu.memory_space<vmem>>, %arg14: memref<1x1xf32, #tpu.memory_space<vmem>>, %arg15: memref<2x8xf32, #tpu.memory_space<vmem>>) attributes {dimension_semantics = [#tpu.dimension_semantics<parallel>], iteration_bounds = array<i64: 1>, scalar_prefetch = 0 : i64, scratch_operands = 0 : i64, tpu.core_type = #tpu.core_type<tc>, window_params = [{transform_indices = @transform_0, window_bounds = array<i64: 4, 8, 4>}, {pipeline_mode = #tpu.pipeline_mode<synchronous>, transform_indices = @transform_1, window_bounds = array<i64: 4, 128>}, {pipeline_mode = #tpu.pipeline_mode<synchronous>, transform_indices = @transform_2, window_bounds = array<i64: 1, 128>}, {pipeline_mode = #tpu.pipeline_mode<synchronous>, transform_indices = @transform_3, window_bounds = array<i64: 128, 384>}, {pipeline_mode = #tpu.pipeline_mode<synchronous>, transform_indices = @transform_4, window_bounds = array<i64: 128, 384>}, {pipeline_mode = #tpu.pipeline_mode<synchronous>, transform_indices = @transform_5, window_bounds = array<i64: 1, 384>}, {pipeline_mode = #tpu.pipeline_mode<synchronous>, transform_indices = @transform_6, window_bounds = array<i64: 1, 128>}, {pipeline_mode = #tpu.pipeline_mode<synchronous>, transform_indices = @transform_7, window_bounds = array<i64: 2, 4, 384>}, {pipeline_mode = #tpu.pipeline_mode<synchronous>, transform_indices = @transform_8, window_bounds = array<i64: 128, 384>}, {pipeline_mode = #tpu.pipeline_mode<synchronous>, transform_indices = @transform_9, window_bounds = array<i64: 1, 128>}, {pipeline_mode = #tpu.pipeline_mode<synchronous>, transform_indices = @transform_10, window_bounds = array<i64: 128, 4>}, {pipeline_mode = #tpu.pipeline_mode<synchronous>, transform_indices = @transform_11, window_bounds = array<i64: 1, 4>}, {pipeline_mode = #tpu.pipeline_mode<synchronous>, transform_indices = @transform_12, window_bounds = array<i64: 1, 4, 1>}, {pipeline_mode = #tpu.pipeline_mode<synchronous>, transform_indices = @transform_13, window_bounds = array<i64: 1, 1>}, {transform_indices = @transform_14, window_bounds = array<i64: 2, 8>}]} {
    %c0 = arith.constant 0 : index
    %c0_0 = arith.constant 0 : index
    %c0_1 = arith.constant 0 : index
    %0 = vector.load %arg1[%c0, %c0_0, %c0_1] : memref<4x8x4xf32, #tpu.memory_space<vmem>>, vector<4x8x4xf32>
    %1 = vector.shape_cast %0 : vector<4x8x4xf32> to vector<32x4xf32>
    %c0_2 = arith.constant 0 : index
    %c0_3 = arith.constant 0 : index
    %2 = vector.load %arg2[%c0_2, %c0_3] : memref<4x128xf32, #tpu.memory_space<vmem>>, vector<4x128xf32>
    %cst = arith.constant dense<0.000000e+00> : vector<32x128xf32>
    %3 = tpu.matmul %1, %2, %cst {dimension_numbers = #tpu.dot_dimension_numbers<[1], [0], [0], [1], [0, 0, 1, 1], [], []>} : vector<32x4xf32>, vector<4x128xf32>, vector<32x128xf32> -> vector<32x128xf32>
    %c0_4 = arith.constant 0 : index
    %c0_5 = arith.constant 0 : index
    %4 = vector.load %arg3[%c0_4, %c0_5] : memref<1x128xf32, #tpu.memory_space<vmem>>, vector<1x128xf32>
    %5 = vector.broadcast %4 : vector<1x128xf32> to vector<32x128xf32>
    %6 = arith.addf %3, %5 : vector<32x128xf32>
    %cst_6 = arith.constant 0.000000e+00 : f32
    %7 = vector.broadcast %cst_6 : f32 to vector<32x128xf32>
    %8 = arith.maximumf %6, %7 : vector<32x128xf32>
    %c0_7 = arith.constant 0 : index
    %c0_8 = arith.constant 0 : index
    %9 = vector.load %arg4[%c0_7, %c0_8] : memref<128x384xf32, #tpu.memory_space<vmem>>, vector<128x384xf32>
    %cst_9 = arith.constant dense<0.000000e+00> : vector<32x384xf32>
    %10 = tpu.matmul %8, %9, %cst_9 {dimension_numbers = #tpu.dot_dimension_numbers<[1], [0], [0], [1], [0, 0, 1, 1], [], []>} : vector<32x128xf32>, vector<128x384xf32>, vector<32x384xf32> -> vector<32x384xf32>
    %c0_10 = arith.constant 0 : index
    %c0_11 = arith.constant 0 : index
    %11 = vector.load %arg6[%c0_10, %c0_11] : memref<1x384xf32, #tpu.memory_space<vmem>>, vector<1x384xf32>
    %12 = vector.broadcast %11 : vector<1x384xf32> to vector<32x384xf32>
    %13 = arith.addf %10, %12 : vector<32x384xf32>
    %c0_12 = arith.constant 0 : index
    %c0_13 = arith.constant 0 : index
    %14 = vector.load %arg5[%c0_12, %c0_13] : memref<128x384xf32, #tpu.memory_space<vmem>>, vector<128x384xf32>
    %c0_14 = arith.constant 0 : index
    %c0_15 = arith.constant 0 : index
    %15 = vector.load %arg7[%c0_14, %c0_15] : memref<1x128xf32, #tpu.memory_space<vmem>>, vector<1x128xf32>
    %16 = vector.shape_cast %15 : vector<1x128xf32> to vector<1x128xf32>
    %17 = vector.broadcast %16 : vector<1x128xf32> to vector<8x128xf32>
    %cst_16 = arith.constant 0.000000e+00 : f32
    %18 = vector.broadcast %cst_16 : f32 to vector<8x128xf32>
    %19 = vector.extract_strided_slice %13 {offsets = [0, 0], sizes = [8, 384], strides = [1, 1]} : vector<32x384xf32> to vector<8x384xf32>
    %cst_17 = arith.constant dense<0.000000e+00> : vector<8x384xf32>
    %20 = tpu.matmul %18, %14, %cst_17 {dimension_numbers = #tpu.dot_dimension_numbers<[1], [0], [0], [1], [0, 0, 1, 1], [], []>} : vector<8x128xf32>, vector<128x384xf32>, vector<8x384xf32> -> vector<8x384xf32>
    %21 = vector.extract_strided_slice %19 {offsets = [0, 0], sizes = [8, 128], strides = [1, 1]} : vector<8x384xf32> to vector<8x128xf32>
    %22 = vector.extract_strided_slice %20 {offsets = [0, 0], sizes = [8, 128], strides = [1, 1]} : vector<8x384xf32> to vector<8x128xf32>
    %23 = arith.addf %21, %22 : vector<8x128xf32>
    %24 = arith.negf %23 : vector<8x128xf32>
    %25 = math.exp %24 : vector<8x128xf32>
    %cst_18 = arith.constant 1.000000e+00 : f32
    %26 = vector.broadcast %cst_18 : f32 to vector<8x128xf32>
    %27 = arith.addf %26, %25 : vector<8x128xf32>
    %28 = arith.divf %26, %27 : vector<8x128xf32>
    %29 = vector.extract_strided_slice %19 {offsets = [0, 128], sizes = [8, 128], strides = [1, 1]} : vector<8x384xf32> to vector<8x128xf32>
    %30 = vector.extract_strided_slice %20 {offsets = [0, 128], sizes = [8, 128], strides = [1, 1]} : vector<8x384xf32> to vector<8x128xf32>
    %31 = arith.addf %29, %30 : vector<8x128xf32>
    %32 = arith.negf %31 : vector<8x128xf32>
    %33 = math.exp %32 : vector<8x128xf32>
    %cst_19 = arith.constant 1.000000e+00 : f32
    %34 = vector.broadcast %cst_19 : f32 to vector<8x128xf32>
    %35 = arith.addf %34, %33 : vector<8x128xf32>
    %36 = arith.divf %34, %35 : vector<8x128xf32>
    %37 = vector.extract_strided_slice %19 {offsets = [0, 256], sizes = [8, 128], strides = [1, 1]} : vector<8x384xf32> to vector<8x128xf32>
    %38 = vector.extract_strided_slice %20 {offsets = [0, 256], sizes = [8, 128], strides = [1, 1]} : vector<8x384xf32> to vector<8x128xf32>
    %39 = arith.addf %38, %17 : vector<8x128xf32>
    %40 = arith.mulf %28, %39 : vector<8x128xf32>
    %41 = arith.addf %37, %40 : vector<8x128xf32>
    %42 = math.tanh %41 : vector<8x128xf32>
    %cst_20 = arith.constant 1.000000e+00 : f32
    %43 = vector.broadcast %cst_20 : f32 to vector<8x128xf32>
    %44 = arith.subf %43, %36 : vector<8x128xf32>
    %45 = arith.mulf %44, %42 : vector<8x128xf32>
    %46 = arith.mulf %36, %18 : vector<8x128xf32>
    %47 = arith.addf %45, %46 : vector<8x128xf32>
    %48 = vector.extract_strided_slice %13 {offsets = [8, 0], sizes = [8, 384], strides = [1, 1]} : vector<32x384xf32> to vector<8x384xf32>
    %cst_21 = arith.constant dense<0.000000e+00> : vector<8x384xf32>
    %49 = tpu.matmul %47, %14, %cst_21 {dimension_numbers = #tpu.dot_dimension_numbers<[1], [0], [0], [1], [0, 0, 1, 1], [], []>} : vector<8x128xf32>, vector<128x384xf32>, vector<8x384xf32> -> vector<8x384xf32>
    %50 = vector.extract_strided_slice %48 {offsets = [0, 0], sizes = [8, 128], strides = [1, 1]} : vector<8x384xf32> to vector<8x128xf32>
    %51 = vector.extract_strided_slice %49 {offsets = [0, 0], sizes = [8, 128], strides = [1, 1]} : vector<8x384xf32> to vector<8x128xf32>
    %52 = arith.addf %50, %51 : vector<8x128xf32>
    %53 = arith.negf %52 : vector<8x128xf32>
    %54 = math.exp %53 : vector<8x128xf32>
    %cst_22 = arith.constant 1.000000e+00 : f32
    %55 = vector.broadcast %cst_22 : f32 to vector<8x128xf32>
    %56 = arith.addf %55, %54 : vector<8x128xf32>
    %57 = arith.divf %55, %56 : vector<8x128xf32>
    %58 = vector.extract_strided_slice %48 {offsets = [0, 128], sizes = [8, 128], strides = [1, 1]} : vector<8x384xf32> to vector<8x128xf32>
    %59 = vector.extract_strided_slice %49 {offsets = [0, 128], sizes = [8, 128], strides = [1, 1]} : vector<8x384xf32> to vector<8x128xf32>
    %60 = arith.addf %58, %59 : vector<8x128xf32>
    %61 = arith.negf %60 : vector<8x128xf32>
    %62 = math.exp %61 : vector<8x128xf32>
    %cst_23 = arith.constant 1.000000e+00 : f32
    %63 = vector.broadcast %cst_23 : f32 to vector<8x128xf32>
    %64 = arith.addf %63, %62 : vector<8x128xf32>
    %65 = arith.divf %63, %64 : vector<8x128xf32>
    %66 = vector.extract_strided_slice %48 {offsets = [0, 256], sizes = [8, 128], strides = [1, 1]} : vector<8x384xf32> to vector<8x128xf32>
    %67 = vector.extract_strided_slice %49 {offsets = [0, 256], sizes = [8, 128], strides = [1, 1]} : vector<8x384xf32> to vector<8x128xf32>
    %68 = arith.addf %67, %17 : vector<8x128xf32>
    %69 = arith.mulf %57, %68 : vector<8x128xf32>
    %70 = arith.addf %66, %69 : vector<8x128xf32>
    %71 = math.tanh %70 : vector<8x128xf32>
    %cst_24 = arith.constant 1.000000e+00 : f32
    %72 = vector.broadcast %cst_24 : f32 to vector<8x128xf32>
    %73 = arith.subf %72, %65 : vector<8x128xf32>
    %74 = arith.mulf %73, %71 : vector<8x128xf32>
    %75 = arith.mulf %65, %47 : vector<8x128xf32>
    %76 = arith.addf %74, %75 : vector<8x128xf32>
    %77 = vector.extract_strided_slice %13 {offsets = [16, 0], sizes = [8, 384], strides = [1, 1]} : vector<32x384xf32> to vector<8x384xf32>
    %cst_25 = arith.constant dense<0.000000e+00> : vector<8x384xf32>
    %78 = tpu.matmul %76, %14, %cst_25 {dimension_numbers = #tpu.dot_dimension_numbers<[1], [0], [0], [1], [0, 0, 1, 1], [], []>} : vector<8x128xf32>, vector<128x384xf32>, vector<8x384xf32> -> vector<8x384xf32>
    %79 = vector.extract_strided_slice %77 {offsets = [0, 0], sizes = [8, 128], strides = [1, 1]} : vector<8x384xf32> to vector<8x128xf32>
    %80 = vector.extract_strided_slice %78 {offsets = [0, 0], sizes = [8, 128], strides = [1, 1]} : vector<8x384xf32> to vector<8x128xf32>
    %81 = arith.addf %79, %80 : vector<8x128xf32>
    %82 = arith.negf %81 : vector<8x128xf32>
    %83 = math.exp %82 : vector<8x128xf32>
    %cst_26 = arith.constant 1.000000e+00 : f32
    %84 = vector.broadcast %cst_26 : f32 to vector<8x128xf32>
    %85 = arith.addf %84, %83 : vector<8x128xf32>
    %86 = arith.divf %84, %85 : vector<8x128xf32>
    %87 = vector.extract_strided_slice %77 {offsets = [0, 128], sizes = [8, 128], strides = [1, 1]} : vector<8x384xf32> to vector<8x128xf32>
    %88 = vector.extract_strided_slice %78 {offsets = [0, 128], sizes = [8, 128], strides = [1, 1]} : vector<8x384xf32> to vector<8x128xf32>
    %89 = arith.addf %87, %88 : vector<8x128xf32>
    %90 = arith.negf %89 : vector<8x128xf32>
    %91 = math.exp %90 : vector<8x128xf32>
    %cst_27 = arith.constant 1.000000e+00 : f32
    %92 = vector.broadcast %cst_27 : f32 to vector<8x128xf32>
    %93 = arith.addf %92, %91 : vector<8x128xf32>
    %94 = arith.divf %92, %93 : vector<8x128xf32>
    %95 = vector.extract_strided_slice %77 {offsets = [0, 256], sizes = [8, 128], strides = [1, 1]} : vector<8x384xf32> to vector<8x128xf32>
    %96 = vector.extract_strided_slice %78 {offsets = [0, 256], sizes = [8, 128], strides = [1, 1]} : vector<8x384xf32> to vector<8x128xf32>
    %97 = arith.addf %96, %17 : vector<8x128xf32>
    %98 = arith.mulf %86, %97 : vector<8x128xf32>
    %99 = arith.addf %95, %98 : vector<8x128xf32>
    %100 = math.tanh %99 : vector<8x128xf32>
    %cst_28 = arith.constant 1.000000e+00 : f32
    %101 = vector.broadcast %cst_28 : f32 to vector<8x128xf32>
    %102 = arith.subf %101, %94 : vector<8x128xf32>
    %103 = arith.mulf %102, %100 : vector<8x128xf32>
    %104 = arith.mulf %94, %76 : vector<8x128xf32>
    %105 = arith.addf %103, %104 : vector<8x128xf32>
    %106 = vector.extract_strided_slice %13 {offsets = [24, 0], sizes = [8, 384], strides = [1, 1]} : vector<32x384xf32> to vector<8x384xf32>
    %cst_29 = arith.constant dense<0.000000e+00> : vector<8x384xf32>
    %107 = tpu.matmul %105, %14, %cst_29 {dimension_numbers = #tpu.dot_dimension_numbers<[1], [0], [0], [1], [0, 0, 1, 1], [], []>} : vector<8x128xf32>, vector<128x384xf32>, vector<8x384xf32> -> vector<8x384xf32>
    %108 = vector.extract_strided_slice %106 {offsets = [0, 0], sizes = [8, 128], strides = [1, 1]} : vector<8x384xf32> to vector<8x128xf32>
    %109 = vector.extract_strided_slice %107 {offsets = [0, 0], sizes = [8, 128], strides = [1, 1]} : vector<8x384xf32> to vector<8x128xf32>
    %110 = arith.addf %108, %109 : vector<8x128xf32>
    %111 = arith.negf %110 : vector<8x128xf32>
    %112 = math.exp %111 : vector<8x128xf32>
    %cst_30 = arith.constant 1.000000e+00 : f32
    %113 = vector.broadcast %cst_30 : f32 to vector<8x128xf32>
    %114 = arith.addf %113, %112 : vector<8x128xf32>
    %115 = arith.divf %113, %114 : vector<8x128xf32>
    %116 = vector.extract_strided_slice %106 {offsets = [0, 128], sizes = [8, 128], strides = [1, 1]} : vector<8x384xf32> to vector<8x128xf32>
    %117 = vector.extract_strided_slice %107 {offsets = [0, 128], sizes = [8, 128], strides = [1, 1]} : vector<8x384xf32> to vector<8x128xf32>
    %118 = arith.addf %116, %117 : vector<8x128xf32>
    %119 = arith.negf %118 : vector<8x128xf32>
    %120 = math.exp %119 : vector<8x128xf32>
    %cst_31 = arith.constant 1.000000e+00 : f32
    %121 = vector.broadcast %cst_31 : f32 to vector<8x128xf32>
    %122 = arith.addf %121, %120 : vector<8x128xf32>
    %123 = arith.divf %121, %122 : vector<8x128xf32>
    %124 = vector.extract_strided_slice %106 {offsets = [0, 256], sizes = [8, 128], strides = [1, 1]} : vector<8x384xf32> to vector<8x128xf32>
    %125 = vector.extract_strided_slice %107 {offsets = [0, 256], sizes = [8, 128], strides = [1, 1]} : vector<8x384xf32> to vector<8x128xf32>
    %126 = arith.addf %125, %17 : vector<8x128xf32>
    %127 = arith.mulf %115, %126 : vector<8x128xf32>
    %128 = arith.addf %124, %127 : vector<8x128xf32>
    %129 = math.tanh %128 : vector<8x128xf32>
    %cst_32 = arith.constant 1.000000e+00 : f32
    %130 = vector.broadcast %cst_32 : f32 to vector<8x128xf32>
    %131 = arith.subf %130, %123 : vector<8x128xf32>
    %132 = arith.mulf %131, %129 : vector<8x128xf32>
    %133 = arith.mulf %123, %105 : vector<8x128xf32>
    %134 = arith.addf %132, %133 : vector<8x128xf32>
    %135 = vector.shape_cast %134 : vector<8x128xf32> to vector<1x8x128xf32>
    %136 = vector.shape_cast %135 : vector<1x8x128xf32> to vector<1x8x128xf32>
    %137 = vector.broadcast %136 : vector<1x8x128xf32> to vector<2x8x128xf32>
    %138 = vector.shape_cast %137 : vector<2x8x128xf32> to vector<16x128xf32>
    %c0_33 = arith.constant 0 : index
    %c0_34 = arith.constant 0 : index
    %c0_35 = arith.constant 0 : index
    %139 = vector.load %arg8[%c0_33, %c0_34, %c0_35] : memref<2x4x384xf32, #tpu.memory_space<vmem>>, vector<2x4x384xf32>
    %140 = vector.shape_cast %139 : vector<2x4x384xf32> to vector<2x1x4x384xf32>
    %141 = vector.shape_cast %140 : vector<2x1x4x384xf32> to vector<2x1x4x384xf32>
    %142 = vector.broadcast %141 : vector<2x1x4x384xf32> to vector<2x2x4x384xf32>
    %143 = vector.shape_cast %142 : vector<2x2x4x384xf32> to vector<16x384xf32>
    %c0_36 = arith.constant 0 : index
    %c0_37 = arith.constant 0 : index
    %144 = vector.load %arg9[%c0_36, %c0_37] : memref<128x384xf32, #tpu.memory_space<vmem>>, vector<128x384xf32>
    %c0_38 = arith.constant 0 : index
    %c0_39 = arith.constant 0 : index
    %145 = vector.load %arg10[%c0_38, %c0_39] : memref<1x128xf32, #tpu.memory_space<vmem>>, vector<1x128xf32>
    %cst_40 = arith.constant dense<0.000000e+00> : vector<16x384xf32>
    %146 = tpu.matmul %138, %144, %cst_40 {dimension_numbers = #tpu.dot_dimension_numbers<[1], [0], [0], [1], [0, 0, 1, 1], [], []>} : vector<16x128xf32>, vector<128x384xf32>, vector<16x384xf32> -> vector<16x384xf32>
    %147 = vector.extract_strided_slice %143 {offsets = [0, 0], sizes = [16, 128], strides = [1, 1]} : vector<16x384xf32> to vector<16x128xf32>
    %148 = vector.extract_strided_slice %146 {offsets = [0, 0], sizes = [16, 128], strides = [1, 1]} : vector<16x384xf32> to vector<16x128xf32>
    %149 = arith.addf %147, %148 : vector<16x128xf32>
    %150 = arith.negf %149 : vector<16x128xf32>
    %151 = math.exp %150 : vector<16x128xf32>
    %cst_41 = arith.constant 1.000000e+00 : f32
    %152 = vector.broadcast %cst_41 : f32 to vector<16x128xf32>
    %153 = arith.addf %152, %151 : vector<16x128xf32>
    %154 = arith.divf %152, %153 : vector<16x128xf32>
    %155 = vector.extract_strided_slice %143 {offsets = [0, 128], sizes = [16, 128], strides = [1, 1]} : vector<16x384xf32> to vector<16x128xf32>
    %156 = vector.extract_strided_slice %146 {offsets = [0, 128], sizes = [16, 128], strides = [1, 1]} : vector<16x384xf32> to vector<16x128xf32>
    %157 = arith.addf %155, %156 : vector<16x128xf32>
    %158 = arith.negf %157 : vector<16x128xf32>
    %159 = math.exp %158 : vector<16x128xf32>
    %cst_42 = arith.constant 1.000000e+00 : f32
    %160 = vector.broadcast %cst_42 : f32 to vector<16x128xf32>
    %161 = arith.addf %160, %159 : vector<16x128xf32>
    %162 = arith.divf %160, %161 : vector<16x128xf32>
    %163 = vector.extract_strided_slice %143 {offsets = [0, 256], sizes = [16, 128], strides = [1, 1]} : vector<16x384xf32> to vector<16x128xf32>
    %164 = vector.extract_strided_slice %146 {offsets = [0, 256], sizes = [16, 128], strides = [1, 1]} : vector<16x384xf32> to vector<16x128xf32>
    %165 = vector.broadcast %145 : vector<1x128xf32> to vector<16x128xf32>
    %166 = arith.addf %164, %165 : vector<16x128xf32>
    %167 = arith.mulf %154, %166 : vector<16x128xf32>
    %168 = arith.addf %163, %167 : vector<16x128xf32>
    %169 = math.tanh %168 : vector<16x128xf32>
    %cst_43 = arith.constant 1.000000e+00 : f32
    %170 = vector.broadcast %cst_43 : f32 to vector<16x128xf32>
    %171 = arith.subf %170, %162 : vector<16x128xf32>
    %172 = arith.mulf %171, %169 : vector<16x128xf32>
    %173 = arith.mulf %162, %138 : vector<16x128xf32>
    %174 = arith.addf %172, %173 : vector<16x128xf32>
    %c0_44 = arith.constant 0 : index
    %c0_45 = arith.constant 0 : index
    %175 = vector.load %arg11[%c0_44, %c0_45] : memref<128x4xf32, #tpu.memory_space<vmem>>, vector<128x4xf32>
    %cst_46 = arith.constant dense<0.000000e+00> : vector<16x4xf32>
    %176 = tpu.matmul %174, %175, %cst_46 {dimension_numbers = #tpu.dot_dimension_numbers<[1], [0], [0], [1], [0, 0, 1, 1], [], []>} : vector<16x128xf32>, vector<128x4xf32>, vector<16x4xf32> -> vector<16x4xf32>
    %c0_47 = arith.constant 0 : index
    %c0_48 = arith.constant 0 : index
    %177 = vector.load %arg12[%c0_47, %c0_48] : memref<1x4xf32, #tpu.memory_space<vmem>>, vector<1x4xf32>
    %178 = vector.broadcast %177 : vector<1x4xf32> to vector<16x4xf32>
    %179 = arith.addf %176, %178 : vector<16x4xf32>
    %180 = vector.extract_strided_slice %179 {offsets = [0, 0], sizes = [8, 4], strides = [1, 1]} : vector<16x4xf32> to vector<8x4xf32>
    %181 = vector.extract_strided_slice %179 {offsets = [8, 0], sizes = [8, 4], strides = [1, 1]} : vector<16x4xf32> to vector<8x4xf32>
    %182 = tpu.concatenate %180, %181 in 1 : vector<8x4xf32>, vector<8x4xf32> -> vector<8x8xf32>
    %183 = vector.shape_cast %182 : vector<8x8xf32> to vector<2x4x8xf32>
    %c0_49 = arith.constant 0 : index
    %c0_50 = arith.constant 0 : index
    %c0_51 = arith.constant 0 : index
    %184 = vector.load %arg13[%c0_49, %c0_50, %c0_51] : memref<1x4x1xf32, #tpu.memory_space<vmem>>, vector<1x4x1xf32>
    %185 = vector.broadcast %184 : vector<1x4x1xf32> to vector<2x4x8xf32>
    %186 = arith.mulf %183, %185 : vector<2x4x8xf32>
    %cst_52 = arith.constant dense<0.000000e+00> : vector<2x8xf32>
    %187 = vector.multi_reduction <add>, %186, %cst_52 [1] : vector<2x4x8xf32> to vector<2x8xf32>
    %c0_53 = arith.constant 0 : index
    %c0_54 = arith.constant 0 : index
    %188 = vector.load %arg14[%c0_53, %c0_54] : memref<1x1xf32, #tpu.memory_space<vmem>>, vector<1x1xf32>
    %189 = vector.broadcast %188 : vector<1x1xf32> to vector<2x8xf32>
    %190 = arith.addf %187, %189 : vector<2x8xf32>
    %cst_55 = arith.constant 0.000000e+00 : f32
    %191 = vector.broadcast %cst_55 : f32 to vector<2x8xf32>
    %192 = arith.maximumf %190, %191 : vector<2x8xf32>
    %c0_56 = arith.constant 0 : index
    %c0_57 = arith.constant 0 : index
    %193 = vector.load %arg15[%c0_56, %c0_57] : memref<2x8xf32, #tpu.memory_space<vmem>>, vector<2x8xf32>
    tpu.vector_store %arg15[%c0_56, %c0_57], %192 {strides = array<i32>} : memref<2x8xf32, #tpu.memory_space<vmem>>, vector<2x8xf32>,
    return
  }
  func.func @transform_0(%arg0: i32) -> (i32, i32, i32) {
    %c0_i32 = arith.constant 0 : i32
    %c0_i32_0 = arith.constant 0 : i32
    %c0_i32_1 = arith.constant 0 : i32
    return %c0_i32, %arg0, %c0_i32_0 : i32, i32, i32
  }
  func.func @transform_1(%arg0: i32) -> (i32, i32) {
    %c0_i32 = arith.constant 0 : i32
    %c0_i32_0 = arith.constant 0 : i32
    %c0_i32_1 = arith.constant 0 : i32
    return %c0_i32, %c0_i32_0 : i32, i32
  }
  func.func @transform_2(%arg0: i32) -> (i32, i32) {
    %c0_i32 = arith.constant 0 : i32
    %c0_i32_0 = arith.constant 0 : i32
    %c0_i32_1 = arith.constant 0 : i32
    return %c0_i32, %c0_i32_0 : i32, i32
  }
  func.func @transform_3(%arg0: i32) -> (i32, i32) {
    %c0_i32 = arith.constant 0 : i32
    %c0_i32_0 = arith.constant 0 : i32
    %c0_i32_1 = arith.constant 0 : i32
    return %c0_i32, %c0_i32_0 : i32, i32
  }
  func.func @transform_4(%arg0: i32) -> (i32, i32) {
    %c0_i32 = arith.constant 0 : i32
    %c0_i32_0 = arith.constant 0 : i32
    %c0_i32_1 = arith.constant 0 : i32
    return %c0_i32, %c0_i32_0 : i32, i32
  }
  func.func @transform_5(%arg0: i32) -> (i32, i32) {
    %c0_i32 = arith.constant 0 : i32
    %c0_i32_0 = arith.constant 0 : i32
    %c0_i32_1 = arith.constant 0 : i32
    return %c0_i32, %c0_i32_0 : i32, i32
  }
  func.func @transform_6(%arg0: i32) -> (i32, i32) {
    %c0_i32 = arith.constant 0 : i32
    %c0_i32_0 = arith.constant 0 : i32
    %c0_i32_1 = arith.constant 0 : i32
    return %c0_i32, %c0_i32_0 : i32, i32
  }
  func.func @transform_7(%arg0: i32) -> (i32, i32, i32) {
    %c0_i32 = arith.constant 0 : i32
    %c0_i32_0 = arith.constant 0 : i32
    %c0_i32_1 = arith.constant 0 : i32
    %c0_i32_2 = arith.constant 0 : i32
    return %c0_i32, %c0_i32_0, %c0_i32_1 : i32, i32, i32
  }
  func.func @transform_8(%arg0: i32) -> (i32, i32) {
    %c0_i32 = arith.constant 0 : i32
    %c0_i32_0 = arith.constant 0 : i32
    %c0_i32_1 = arith.constant 0 : i32
    return %c0_i32, %c0_i32_0 : i32, i32
  }
  func.func @transform_9(%arg0: i32) -> (i32, i32) {
    %c0_i32 = arith.constant 0 : i32
    %c0_i32_0 = arith.constant 0 : i32
    %c0_i32_1 = arith.constant 0 : i32
    return %c0_i32, %c0_i32_0 : i32, i32
  }
  func.func @transform_10(%arg0: i32) -> (i32, i32) {
    %c0_i32 = arith.constant 0 : i32
    %c0_i32_0 = arith.constant 0 : i32
    %c0_i32_1 = arith.constant 0 : i32
    return %c0_i32, %c0_i32_0 : i32, i32
  }
  func.func @transform_11(%arg0: i32) -> (i32, i32) {
    %c0_i32 = arith.constant 0 : i32
    %c0_i32_0 = arith.constant 0 : i32
    %c0_i32_1 = arith.constant 0 : i32
    return %c0_i32, %c0_i32_0 : i32, i32
  }
  func.func @transform_12(%arg0: i32) -> (i32, i32, i32) {
    %c0_i32 = arith.constant 0 : i32
    %c0_i32_0 = arith.constant 0 : i32
    %c0_i32_1 = arith.constant 0 : i32
    %c0_i32_2 = arith.constant 0 : i32
    return %c0_i32, %c0_i32_0, %c0_i32_1 : i32, i32, i32
  }
  func.func @transform_13(%arg0: i32) -> (i32, i32) {
    %c0_i32 = arith.constant 0 : i32
    %c0_i32_0 = arith.constant 0 : i32
    %c0_i32_1 = arith.constant 0 : i32
    return %c0_i32, %c0_i32_0 : i32, i32
  }
  func.func @transform_14(%arg0: i32) -> (i32, i32) {
    %c0_i32 = arith.constant 0 : i32
    %c0_i32_0 = arith.constant 0 : i32
    return %arg0, %c0_i32 : i32, i32
  }
}

</mosaic_0001>

<bundles_post_ra>
// kernel: tpu_custom_call.1
= control target key start
LH: loop header
LB: loop body
LE: loop exit
PB: predicated region body
PF: predicated region fallthrough
CT: control target
= control target key end

     0   :  { %s3140_s0 = inlined_call_operand.vmem [shape: f32[4,8,4], index: 0, kind: input, shape index: {}]   ;;  %s3141_s1 = inlined_call_operand.vmem [shape: f32[4,128], index: 1, kind: input, shape index: {}]   ;;  %s3142_s2 = inlined_call_operand.vmem [shape: f32[1,128], index: 2, kind: input, shape index: {}]   ;;  %s3143_s3 = inlined_call_operand.hbm [shape: f32[128,384], index: 3, kind: input, shape index: {}]   ;;  %s3144_s4 = inlined_call_operand.hbm [shape: f32[128,384], index: 4, kind: input, shape index: {}]   ;;  %s3145_s5 = inlined_call_operand.vmem [shape: f32[1,384], index: 5, kind: input, shape index: {}]   ;;  %s3146_s6 = inlined_call_operand.vmem [shape: f32[1,128], index: 6, kind: input, shape index: {}]   ;;  %s3147_s7 = inlined_call_operand.vmem [shape: f32[2,4,384], index: 7, kind: input, shape index: {}]   ;;  %s3148_s8 = inlined_call_operand.hbm [shape: f32[128,384], index: 8, kind: input, shape index: {}]   ;;  %s3149_s9 = inlined_call_operand.vmem [shape: f32[1,128], index: 9, kind: input, shape index: {}]   ;;  %s3150_s10 = inlined_call_operand.vmem [shape: f32[128,4], index: 10, kind: input, shape index: {}]   ;;  %s3151_s11 = inlined_call_operand.vmem [shape: f32[1,4], index: 11, kind: input, shape index: {}]   ;;  %s3152_s12 = inlined_call_operand.vmem [shape: f32[1,4,1], index: 12, kind: input, shape index: {}]   ;;  %s3153_s13 = inlined_call_operand.<no memory space> [shape: f32[1,1], index: 13, kind: input, shape index: {}]   ;;  %s3154_s14 = inlined_call_operand.hbm [shape: f32[2,8], index: 14, kind: output, shape index: {}]  }
   0x1   :  { %v19_v0 = vstv %s3153_s13 }
   0x2   :  { %20 = vst [vmem:[#allocation2] sm:$0x1] %v19_v0 }
   0x3   :  { %21 = vsyncpa [#allocation4], 0 }
   0x4   :  { %22 = vsyncpa [#allocation7], 0 }
   0x5   :  { %23 = vsyncpa [#allocation5], 0  ;;  %s2651_s15 = smov [#allocation6]   ;;  %s2652_s17 = smov [#allocation3]  }
   0x6   :  { %s47_s16 = sshll.u32 %s2651_s15, 4  ;;  %s35_s18 = sshll.u32 %s2652_s17, 4  ;;  %s48_s16 = int_to_ptr.vmem [resolvable:$true] %s47_s16  ;;  %s2740_s18 = int_to_ptr.vmem [resolvable:$true] %s35_s18 }
   0x7   :  { %s2557_s21 = scalar_lea.hbm %s3144_s4, 6144 }
   0x8   :  { %p2558_p0 = scmp.ne.s32.totalorder %s3144_s4, %s2557_s21  ;;  %p2561_p1 = scmp.lt.u32.totalorder %s2557_s21, %s3144_s4 }
   0xa   :  { %p2563_p2 = pnand %p2561_p1, %p2558_p0 }
   0xc   :  { %2566 = shalt.err (!%p2563_p2)
}
   0xd   :  { %s2567_s25 = scalar_lea.vmem %s48_s16, 6144  ;;  %p2572_p4 = scmp.lt.s32.totalorder %s48_s16, %s48_s16 }
   0xe   :  { %p2568_p3 = scmp.ne.s32.totalorder %s48_s16, %s2567_s25  ;;  %p2573_p5 = scmp.lt.s32.totalorder %s2567_s25, %s2567_s25 }
  0x10   :  { %p2574_p6 = por %p2573_p5, %p2572_p4 }
  0x12   :  { %p2575_p7 = pnand %p2574_p6, %p2568_p3 }
  0x14   :  { %2578 = shalt.err (!%p2575_p7)
}
  0x15   :  { %s2653_s26 = smov 384   ;;  %s2654_s27 = smov 24  }
  0x16   :  { %53 = dma.hbm_to_vmem [thread:$0]  %s3144_s4, 6144, %s48_s16, [#allocation7], %s2653_s26, %s2653_s26, %s2654_s27  }
  0x17   :  { %s2579_s17 = scalar_lea.hbm %s3143_s3, 6144 }
  0x18   :  { %p2580_p8 = scmp.ne.s32.totalorder %s3143_s3, %s2579_s17  ;;  %p2583_p9 = scmp.lt.u32.totalorder %s2579_s17, %s3143_s3 }
  0x1a   :  { %p2585_p10 = pnand %p2583_p9, %p2580_p8 }
  0x1c   :  { %2588 = shalt.err (!%p2585_p10)
}
  0x1d   :  { %s2589_s23 = scalar_lea.vmem %s2740_s18, 6144  ;;  %p2594_p12 = scmp.lt.s32.totalorder %s2740_s18, %s2740_s18 }
  0x1e   :  { %p2590_p11 = scmp.ne.s32.totalorder %s2740_s18, %s2589_s23  ;;  %p2595_p13 = scmp.lt.s32.totalorder %s2589_s23, %s2589_s23 }
  0x20   :  { %p2596_p0 = por %p2595_p13, %p2594_p12 }
  0x22   :  { %p2597_p1 = pnand %p2596_p0, %p2590_p11 }
  0x24   :  { %2600 = shalt.err (!%p2597_p1)
}
  0x25   :  { %41 = dma.hbm_to_vmem [thread:$0]  %s3143_s3, 6144, %s2740_s18, [#allocation4], %s2653_s26, %s2653_s26, %s2654_s27  }
  0x26   :  { %s2655_s13 = smov [#allocation8]   ;;  %s2601_s29 = scalar_lea.hbm %s3148_s8, 6144 }
  0x27   :  { %s65_s24 = sshll.u32 %s2655_s13, 4  ;;  %p2602_p2 = scmp.ne.s32.totalorder %s3148_s8, %s2601_s29  ;;  %s66_s24 = int_to_ptr.vmem [resolvable:$true] %s65_s24 }
  0x28   :  { %p2605_p3 = scmp.lt.u32.totalorder %s2601_s29, %s3148_s8 }
  0x2a   :  { %p2607_p4 = pnand %p2605_p3, %p2602_p2 }
  0x2c   :  { %2610 = shalt.err (!%p2607_p4)
}
  0x2d   :  { %s2611_s20 = scalar_lea.vmem %s66_s24, 6144  ;;  %p2616_p6 = scmp.lt.s32.totalorder %s66_s24, %s66_s24 }
  0x2e   :  { %p2612_p5 = scmp.ne.s32.totalorder %s66_s24, %s2611_s20  ;;  %p2617_p7 = scmp.lt.s32.totalorder %s2611_s20, %s2611_s20 }
  0x30   :  { %p2618_p8 = por %p2617_p7, %p2616_p6 }
  0x32   :  { %p2619_p9 = pnand %p2618_p8, %p2612_p5 }
  0x34   :  { %2622 = shalt.err (!%p2619_p9)
}
  0x35   :  { %71 = dma.hbm_to_vmem [thread:$0]  %s3148_s8, 6144, %s66_s24, [#allocation7], %s2653_s26, %s2653_s26, %s2654_s27  }
  0x36   :  { %2645 = dma.done.wait [#allocation4], 6144  }
  0x37   :  { %2646 = vsyncadd [#allocation4], 4294961152 }
  0x38   :  { %2647 = dma.done.wait [#allocation7], 12288  }
  0x39   :  { %2648 = vsyncadd [#allocation7], 4294955008  ;;  %vm116_vm0 = vcmask 1043456   ;;  %vm103_vm1 = vcmask 31744   ;;  %v95_v1 = vld [vmem:[%s3141_s1] sm:$0xf] }
  0x3a   :  { %v91_v2 = vld [vmem:[%s3140_s0] sm:$0xff]  ;;  %v92_v3 = vld [vmem:[%s3140_s0 + $0x8] sm:$0xff]  ;;  %1808 = vmatprep.subr.msk.mxu0 %vm116_vm0, %v95_v1  ;;  %v93_v4 = vld [vmem:[%s3140_s0 + $0x10] sm:$0xff]  ;;  %vm2658_vm2 = vmmov 0   ;;  %s2660_s27 = smov 4   ;;  %vm1601_vm3 = vcmask 60416  }
  0x3b   :  { %1810 = vmatprep.mubr.msk.f32.mxu0 %vm103_vm1, %v91_v2  ;;  %v210_v5 = vld [vmem:[#allocation3 + $0x8] sm:$0xff]  ;;  %1809 = vmatpush3.msk.msra.mxu0 %vm116_vm0, %v95_v1  ;;  %v94_v6 = vld [vmem:[%s3140_s0 + $0x18] sm:$0xff]  ;;  %v213_v7 = vld [vmem:[#allocation3 + $0x20] sm:$0xff]  ;;  %vm1632_vm4 = vcmask 1041409   ;;  %vm1635_vm5 = vcmask 58368  }
  0x3c   :  { %v209_v8 = vld [vmem:[#allocation3] sm:$0xff]  ;;  %v212_v9 = vld [vmem:[#allocation3 + $0x18] sm:$0xff]  ;;  %1811 = vmatmul.mubr.msk.f32.vlgmr.msra.gmra.mrb[0].mxu0 %vm103_vm1, %v92_v3  ;;  %v2064_v10 = vpack.c.bf16 %v213_v7, %v210_v5  ;;  %v211_v12 = vld [vmem:[#allocation3 + $0x10] sm:$0xff] }
  0x3d   :  { %v2066_v11 = vpack.c.bf16 %v212_v9, %v209_v8  ;;  %v214_v13 = vld [vmem:[#allocation3 + $0x28] sm:$0xff]  ;;  %v216_v14 = vld [vmem:[#allocation3 + $0x38] sm:$0xff]  ;;  %1813 = vmatprep.mubr.msk.f32.mxu0 %vm103_vm1, %v93_v4  ;;  %v219_v16 = vld [vmem:[#allocation3 + $0x50] sm:$0xff] }
  0x3e   :  { %v2096_v15 = vpack.c.bf16 %v214_v13, %v211_v12  ;;  %v215_v17 = vld [vmem:[#allocation3 + $0x30] sm:$0xff]  ;;  %v218_v18 = vld [vmem:[#allocation3 + $0x48] sm:$0xff]  ;;  %2065 = vmatprep.subr.bf16.mxu1 %v2064_v10  ;;  %v2068_v19 = vpack.c.bf16 %v219_v16, %v216_v14  ;;  %v217_v20 = vld [vmem:[#allocation3 + $0x40] sm:$0xff] }
  0x3f   :  { %v220_v21 = vld [vmem:[#allocation3 + $0x58] sm:$0xff]  ;;  %v222_v22 = vld [vmem:[#allocation3 + $0x68] sm:$0xff]  ;;  %2067 = vmatpush1.bf16.msra.mxu1 %v2066_v11  ;;  %v2070_v23 = vpack.c.bf16 %v218_v18, %v215_v17  ;;  %v225_v25 = vld [vmem:[#allocation3 + $0x80] sm:$0xff]  ;;  %v2656_v17 = vmov 0.0   ;;  %v2657_v18 = vmov 0.0|0.0  }
  0x40   :  { %2097 = vmatprep.subr.bf16.mxu0 %v2096_v15  ;;  %v2100_v24 = vpack.c.bf16 %v220_v21, %v217_v20  ;;  %v221_v26 = vld [vmem:[#allocation3 + $0x60] sm:$0xff]  ;;  %1814 = vmatmul.mubr.msk.f32.gmra.mrb[2].mxu0 %vm103_vm1, %v94_v6  ;;  %v2072_v27 = vpack.c.bf16 %v225_v25, %v222_v22  ;;  %v224_v28 = vld [vmem:[#allocation3 + $0x78] sm:$0xff]  ;;  %v223_v29 = vld [vmem:[#allocation3 + $0x70] sm:$0xff] }
  0x41   :  { %2069 = vmatprep.subr.bf16.mxu1 %v2068_v19  ;;  %v226_v30 = vld [vmem:[#allocation3 + $0x88] sm:$0xff]  ;;  %2099 = vmatpush3.bf16.msra.mxu0 %v2096_v15  ;;  %v228_v31 = vld [vmem:[#allocation3 + $0x98] sm:$0xff]  ;;  %v231_v32 = vld [vmem:[#allocation3 + $0xb0] sm:$0xff]  ;;  %v2074_v34 = vpack.c.bf16 %v224_v28, %v221_v26 }
  0x42   :  { %2101 = vmatprep.subr.bf16.mxu0 %v2100_v24  ;;  %v2104_v33 = vpack.c.bf16 %v226_v30, %v223_v29  ;;  %v229_v35 = vld [vmem:[#allocation3 + $0xa0] sm:$0xff]  ;;  %v232_v36 = vld [vmem:[#allocation3 + $0xb8] sm:$0xff]  ;;  %v2076_v37 = vpack.c.bf16 %v231_v32, %v228_v31  ;;  %v227_v38 = vld [vmem:[#allocation3 + $0x90] sm:$0xff]  ;;  %338 = vmatprep.mubr.f32.mxu1 %v2656_v17 }
  0x43   :  { %2071 = vmatpush1.bf16.msra.mxu1 %v2070_v23  ;;  %v230_v39 = vld [vmem:[#allocation3 + $0xa8] sm:$0xff]  ;;  %v237_v41 = vld [vmem:[#allocation3 + $0xe0] sm:$0xff]  ;;  %v2108_v42 = vpack.c.bf16 %v232_v36, %v229_v35  ;;  %v235_v44 = vld [vmem:[#allocation3 + $0xd0] sm:$0xff] }
  0x44   :  { %2073 = vmatprep.subr.bf16.mxu1 %v2072_v27  ;;  %v234_v40 = vld [vmem:[#allocation3 + $0xc8] sm:$0xff]  ;;  %v2078_v43 = vpack.c.bf16 %v230_v39, %v227_v38  ;;  %v233_v47 = vld [vmem:[#allocation3 + $0xc0] sm:$0xff]  ;;  %v236_v48 = vld [vmem:[#allocation3 + $0xd8] sm:$0xff] }
  0x45   :  { %2103 = vmatpush3.bf16.msra.mxu0 %v2100_v24  ;;  %v238_v45 = vld [vmem:[#allocation3 + $0xe8] sm:$0xff]  ;;  %v2080_v46 = vpack.c.bf16 %v237_v41, %v234_v40  ;;  %v240_v49 = vld [vmem:[#allocation3 + $0xf8] sm:$0xff]  ;;  %v243_v50 = vld [vmem:[#allocation3 + $0x110] sm:$0xff]  ;;  %v2082_v52 = vpack.c.bf16 %v236_v48, %v233_v47 }
  0x46   :  { %2105 = vmatprep.subr.bf16.mxu0 %v2104_v33  ;;  %v2112_v51 = vpack.c.bf16 %v238_v45, %v235_v44  ;;  %v241_v53 = vld [vmem:[#allocation3 + $0x100] sm:$0xff]  ;;  %v244_v54 = vld [vmem:[#allocation3 + $0x118] sm:$0xff]  ;;  %v2084_v55 = vpack.c.bf16 %v243_v50, %v240_v49  ;;  %v239_v56 = vld [vmem:[#allocation3 + $0xf0] sm:$0xff] }
  0x47   :  { %2075 = vmatpush1.bf16.msra.mxu1 %v2074_v34  ;;  %v242_v57 = vld [vmem:[#allocation3 + $0x108] sm:$0xff]  ;;  %v249_v59 = vld [vmem:[#allocation3 + $0x140] sm:$0xff]  ;;  %v2116_v60 = vpack.c.bf16 %v244_v54, %v241_v53  ;;  %v247_v62 = vld [vmem:[#allocation3 + $0x130] sm:$0xff] }
  0x48   :  { %2077 = vmatprep.subr.bf16.mxu1 %v2076_v37  ;;  %v246_v58 = vld [vmem:[#allocation3 + $0x128] sm:$0xff]  ;;  %v2086_v61 = vpack.c.bf16 %v242_v57, %v239_v56  ;;  %v245_v1 = vld [vmem:[#allocation3 + $0x120] sm:$0xff]  ;;  %v248_v2 = vld [vmem:[#allocation3 + $0x138] sm:$0xff] }
  0x49   :  { %2107 = vmatpush3.bf16.msra.mxu0 %v2104_v33  ;;  %v250_v63 = vld [vmem:[#allocation3 + $0x148] sm:$0xff]  ;;  %v2088_v0 = vpack.c.bf16 %v249_v59, %v246_v58  ;;  %v2090_v4 = vpack.c.bf16 %v248_v2, %v245_v1  ;;  %v252_v5 = vld [vmem:[#allocation3 + $0x158] sm:$0xff]  ;;  %v255_v6 = vld [vmem:[#allocation3 + $0x170] sm:$0xff] }
  0x4a   :  { %2109 = vmatprep.subr.bf16.mxu0 %v2108_v42  ;;  %v2120_v3 = vpack.c.bf16 %v250_v63, %v247_v62  ;;  %v2092_v7 = vpack.c.bf16 %v255_v6, %v252_v5  ;;  %v251_v8 = vld [vmem:[#allocation3 + $0x150] sm:$0xff]  ;;  %v254_v9 = vld [vmem:[#allocation3 + $0x168] sm:$0xff]  ;;  %v253_v11 = vld [vmem:[#allocation3 + $0x160] sm:$0xff] }
  0x4b   :  { %2079 = vmatpush1.bf16.msra.mxu1 %v2078_v43  ;;  %v2094_v10 = vpack.c.bf16 %v254_v9, %v251_v8  ;;  %v256_v12 = vld [vmem:[#allocation3 + $0x178] sm:$0xff]  ;;  %v449_v14 = vld [vmem:[#allocation6 + $0x8] sm:$0xff]  ;;  %v452_v15 = vld [vmem:[#allocation6 + $0x20] sm:$0xff] }
  0x4c   :  { %2081 = vmatprep.subr.bf16.mxu1 %v2080_v46  ;;  %v2124_v13 = vpack.c.bf16 %v256_v12, %v253_v11  ;;  %v2811_v16 = vpack.c.bf16 %v452_v15, %v449_v14  ;;  %v1653_v19 = vld [vmem:[%s3142_s2] ss:$0 sm:$0xff]  ;;  %v448_v21 = vld [vmem:[#allocation6] sm:$0xff]  ;;  %v458_v26 = vld [vmem:[#allocation6 + $0x50] sm:$0xff] }
  0x4d   :  { %2111 = vmatpush3.bf16.msra.mxu0 %v2108_v42  ;;  %v451_v22 = vld [vmem:[#allocation6 + $0x18] sm:$0xff]  ;;  %v450_v28 = vld [vmem:[#allocation6 + $0x10] sm:$0xff]  ;;  %v453_v29 = vld [vmem:[#allocation6 + $0x28] sm:$0xff] }
  0x4e   :  { %2113 = vmatprep.subr.bf16.mxu0 %v2112_v51  ;;  %v455_v25 = vld [vmem:[#allocation6 + $0x38] sm:$0xff]  ;;  %v2819_v30 = vpack.c.bf16 %v451_v22, %v448_v21  ;;  %v454_v33 = vld [vmem:[#allocation6 + $0x30] sm:$0xff]  ;;  %v457_v34 = vld [vmem:[#allocation6 + $0x48] sm:$0xff]  ;;  %v2823_v41 = vpack.c.bf16 %v453_v29, %v450_v28 }
  0x4f   :  { %2083 = vmatpush1.bf16.msra.mxu1 %v2082_v52  ;;  %v2821_v32 = vpack.c.bf16 %v458_v26, %v455_v25  ;;  %v461_v37 = vld [vmem:[#allocation6 + $0x68] sm:$0xff]  ;;  %v464_v38 = vld [vmem:[#allocation6 + $0x80] sm:$0xff]  ;;  %v2826_v43 = vpack.c.bf16 %v457_v34, %v454_v33  ;;  %v459_v45 = vld [vmem:[#allocation6 + $0x58] sm:$0xff] }
  0x50   :  { %2085 = vmatprep.subr.bf16.mxu1 %v2084_v55  ;;  %v456_v44 = vld [vmem:[#allocation6 + $0x40] sm:$0xff]  ;;  %v2830_v46 = vpack.c.bf16 %v464_v38, %v461_v37  ;;  %v463_v48 = vld [vmem:[#allocation6 + $0x78] sm:$0xff]  ;;  %v470_v52 = vld [vmem:[#allocation6 + $0xb0] sm:$0xff] }
  0x51   :  { %2115 = vmatpush3.bf16.msra.mxu0 %v2112_v51  ;;  %v460_v47 = vld [vmem:[#allocation6 + $0x60] sm:$0xff]  ;;  %v467_v51 = vld [vmem:[#allocation6 + $0x98] sm:$0xff]  ;;  %v2833_v53 = vpack.c.bf16 %v459_v45, %v456_v44  ;;  %v462_v55 = vld [vmem:[#allocation6 + $0x70] sm:$0xff]  ;;  %v259_v44 = vlaneseq }
  0x52   :  { %2117 = vmatprep.subr.bf16.mxu0 %v2116_v60  ;;  %v2836_v54 = vpack.c.bf16 %v463_v48, %v460_v47  ;;  %v465_v56 = vld [vmem:[#allocation6 + $0x88] sm:$0xff]  ;;  %v2840_v57 = vpack.c.bf16 %v470_v52, %v467_v51  ;;  %v466_v58 = vld [vmem:[#allocation6 + $0x90] sm:$0xff]  ;;  %v471_v1 = vld [vmem:[#allocation6 + $0xb8] sm:$0xff] }
  0x53   :  { %2087 = vmatpush1.bf16.msra.mxu1 %v2086_v61  ;;  %v469_v59 = vld [vmem:[#allocation6 + $0xa8] sm:$0xff]  ;;  %v476_v61 = vld [vmem:[#allocation6 + $0xe0] sm:$0xff]  ;;  %v2846_v62 = vpack.c.bf16 %v465_v56, %v462_v55  ;;  %v479_v5 = vld [vmem:[#allocation6 + $0xf8] sm:$0xff]  ;;  %v260_v45 = vshrl.u32 %v259_v44, 7 }
  0x54   :  { %2089 = vmatprep.subr.bf16.mxu1 %v2088_v0  ;;  %v2849_v63 = vpack.c.bf16 %v469_v59, %v466_v58  ;;  %v468_v0 = vld [vmem:[#allocation6 + $0xa0] sm:$0xff]  ;;  %v482_v6 = vld [vmem:[#allocation6 + $0x110] sm:$0xff]  ;;  %v485_v14 = vld [vmem:[#allocation6 + $0x128] sm:$0xff] }
  0x55   :  { %2119 = vmatpush3.bf16.msra.mxu0 %v2116_v60  ;;  %v473_v60 = vld [vmem:[#allocation6 + $0xc8] sm:$0xff]  ;;  %v474_v9 = vld [vmem:[#allocation6 + $0xd0] sm:$0xff]  ;;  %v2864_v11 = vpack.c.bf16 %v482_v6, %v479_v5  ;;  %v488_v15 = vld [vmem:[#allocation6 + $0x140] sm:$0xff]  ;;  %v269_v47 = vsub.s32 2, %v260_v45 }
  0x56   :  { %2121 = vmatprep.subr.bf16.mxu0 %v2120_v3  ;;  %v2853_v2 = vpack.c.bf16 %v476_v61, %v473_v60  ;;  %v478_v12 = vld [vmem:[#allocation6 + $0xf0] sm:$0xff]  ;;  %v480_v21 = vld [vmem:[#allocation6 + $0x100] sm:$0xff]  ;;  %v483_v22 = vld [vmem:[#allocation6 + $0x118] sm:$0xff]  ;;  %v261_v60 = vsub.s32 0, %v260_v45  ;;  %v265_v61 = vsub.s32 1, %v260_v45 }
  0x57   :  { %2091 = vmatpush1.bf16.msra.mxu1 %v2090_v4  ;;  %v475_v4 = vld [vmem:[#allocation6 + $0xd8] sm:$0xff]  ;;  %v2878_v28 = vpack.c.bf16 %v483_v22, %v480_v21  ;;  %v489_v33 = vld [vmem:[#allocation6 + $0x148] sm:$0xff] }
  0x58   :  { %2093 = vmatprep.subr.bf16.mxu1 %v2092_v7  ;;  %v2857_v7 = vpack.c.bf16 %v471_v1, %v468_v0  ;;  %v487_v25 = vld [vmem:[#allocation6 + $0x138] sm:$0xff] }
  0x59   :  { %2123 = vmatpush3.bf16.msra.mxu0 %v2120_v3  ;;  %v472_v3 = vld [vmem:[#allocation6 + $0xc0] sm:$0xff]  ;;  %v491_v26 = vld [vmem:[#allocation6 + $0x158] sm:$0xff] }
  0x5a   :  { %2125 = vmatprep.subr.bf16.mxu0 %v2124_v13  ;;  %v2860_v8 = vpack.c.bf16 %v475_v4, %v472_v3  ;;  %v257_v48 = vld [vmem:[%s3145_s5] sm:$0x7] }
  0x5b   :  { %2095 = vmatpush1.bf16.msra.mxu1 %v2094_v10  ;;  %v477_v10 = vld [vmem:[#allocation6 + $0xe8] sm:$0xff]  ;;  %v2949_v0 = vrot.slane %v257_v48, %v261_v60  ;;  %v2951_v3 = vrot.slane %v257_v48, %v265_v61  ;;  %v2958_v22 = vld [vmem:[%s3146_s6] ss:$0 sm:$0xff] }
  0x5c   :  { %2129 = vmatprep.subr.bf16.mxu1 %v2811_v16 }
  0x5d   :  { %2127 = vmatpush3.bf16.msra.mxu0 %v2124_v13  ;;  %v481_v13 = vld [vmem:[#allocation6 + $0x108] sm:$0xff] }
  0x5e   :  { %2160 = vmatprep.subr.bf16.mxu0 %v2657_v18 }
 0x10f   :  { %v1812_v20 = vpop.f32.mrb[0].mxu0 }
 0x110   :  { %v192_v23 = vadd.f32 %v1812_v20, %v1653_v19  ;;  %v186_v24 = vpop.f32.mrb[1].mxu0  ;;  %v2871_v20 = vpack.c.bf16 %v481_v13, %v478_v12 }
 0x111   :  { %v187_v27 = vadd.f32 %v1653_v19, %v186_v24  ;;  %v484_v24 = vld [vmem:[#allocation6 + $0x120] sm:$0xff] }
 0x112   :  { %v206_v36 = vmax.f32 %v192_v23, 0.0  ;;  %v2875_v23 = vpack.c.bf16 %v488_v15, %v485_v14  ;;  %v2881_v29 = vpack.c.bf16 %v487_v25, %v484_v24 }
 0x113   :  { %v205_v31 = vmax.f32 %v187_v27, 0.0  ;;  %v1815_v35 = vpop.f32.mrb[2].mxu0  ;;  %v494_v27 = vld [vmem:[#allocation6 + $0x170] sm:$0xff] }
 0x114   :  { %v202_v39 = vadd.f32 %v1815_v35, %v1653_v19  ;;  %v196_v40 = vpop.f32.mrb[3].mxu0  ;;  %v2885_v34 = vpack.c.bf16 %v494_v27, %v491_v26  ;;  %v490_v35 = vld [vmem:[#allocation6 + $0x150] sm:$0xff] }
 0x115   :  { %339 = vmatmul.mubr.f32.vlgmr.msra.gmra.mrb[0].mxu1 %v205_v31  ;;  %1848 = vmatprep.mubr.f32.mxu0 %v205_v31  ;;  %v197_v42 = vadd.f32 %v1653_v19, %v196_v40  ;;  %v2868_v19 = vpack.c.bf16 %v477_v10, %v474_v9  ;;  %v486_v31 = vld [vmem:[#allocation6 + $0x130] sm:$0xff]  ;;  %v495_v40 = vld [vmem:[#allocation6 + $0x178] sm:$0xff] }
 0x116   :  { %2131 = vmatpush1.bf16.msra.mxu1 %v2819_v30  ;;  %1849 = vmatmul.mubr.f32.vlgmr.msra.gmra.mrb[4].mxu0 %v206_v36  ;;  %v208_v49 = vmax.f32 %v202_v39, 0.0  ;;  %v2888_v37 = vpack.c.bf16 %v489_v33, %v486_v31  ;;  %v492_v39 = vld [vmem:[#allocation6 + $0x160] sm:$0xff] }
 0x117   :  { %344 = vmatprep.mubr.f32.mxu1 %v2656_v17  ;;  %2133 = vmatprep.subr.bf16.mxu1 %v2821_v32  ;;  %v207_v50 = vmax.f32 %v197_v42, 0.0  ;;  %v2896_v42 = vpack.c.bf16 %v495_v40, %v492_v39 }
 0x118   :  { %2162 = vmatpush3.bf16.msra.mxu0 %v2823_v41 }
 0x119   :  { %345 = vmatmul.mubr.f32.gmra.mrb[2].mxu1 %v206_v36  ;;  %1851 = vmatprep.mubr.f32.mxu0 %v207_v50  ;;  %v493_v36 = vld [vmem:[#allocation6 + $0x168] sm:$0xff] }
 0x11a   :  { %2135 = vmatpush1.bf16.msra.mxu1 %v2826_v43  ;;  %350 = vmatprep.mubr.f32.mxu1 %v2656_v17  ;;  %v2891_v38 = vpack.c.bf16 %v493_v36, %v490_v35 }
 0x11b   :  { %2137 = vmatprep.subr.bf16.mxu1 %v2830_v46  ;;  %1852 = vmatmul.mubr.f32.gmra.mrb[6].mxu0 %v208_v49 }
 0x11c   :  { %2163 = vmatprep.subr.bf16.mxu0 %v2657_v18  ;;  %1886 = vmatprep.mubr.msk.f32.mxu0 %vm2658_vm2, %v2656_v17 }
 0x11d   :  { %351 = vmatmul.mubr.f32.gmra.mrb[4].mxu1 %v207_v50  ;;  %2165 = vmatpush3.bf16.msra.mxu0 %v2833_v53 }
 0x11e   :  { %2139 = vmatpush1.bf16.msra.mxu1 %v2836_v54  ;;  %356 = vmatprep.mubr.f32.mxu1 %v2656_v17 }
 0x11f   :  { %2141 = vmatprep.subr.bf16.mxu1 %v2840_v57  ;;  %2166 = vmatprep.subr.bf16.mxu0 %v2657_v18 }
 0x121   :  { %357 = vmatmul.mubr.f32.gmra.mrb[6].mxu1 %v208_v49  ;;  %2168 = vmatpush3.bf16.msra.mxu0 %v2846_v62  ;;  %v270_v49 = vrot.slane %v257_v48, %v269_v47 }
 0x122   :  { %2143 = vmatpush1.bf16.msra.mxu1 %v2849_v63  ;;  %567 = vmatprep.mubr.f32.mxu1 %v2656_v17 }
 0x123   :  { %2145 = vmatprep.subr.bf16.mxu1 %v2853_v2  ;;  %2169 = vmatprep.subr.bf16.mxu0 %v2657_v18 }
 0x125   :  { %2171 = vmatpush3.bf16.msra.mxu0 %v2857_v7 }
 0x126   :  { %2147 = vmatpush1.bf16.msra.mxu1 %v2860_v8  ;;  %2172 = vmatprep.subr.bf16.mxu0 %v2657_v18 }
 0x127   :  { %2149 = vmatprep.subr.bf16.mxu1 %v2864_v11 }
 0x129   :  { %2174 = vmatpush3.bf16.msra.mxu0 %v2868_v19 }
 0x12a   :  { %2151 = vmatpush1.bf16.msra.mxu1 %v2871_v20  ;;  %2175 = vmatprep.subr.bf16.mxu0 %v2657_v18 }
 0x12b   :  { %2153 = vmatprep.subr.bf16.mxu1 %v2875_v23 }
 0x12d   :  { %2177 = vmatpush3.bf16.msra.mxu0 %v2878_v28 }
 0x12e   :  { %2155 = vmatpush1.bf16.msra.mxu1 %v2881_v29  ;;  %2178 = vmatprep.subr.bf16.mxu0 %v2657_v18 }
 0x12f   :  { %2157 = vmatprep.subr.bf16.mxu1 %v2885_v34 }
 0x131   :  { %2180 = vmatpush3.bf16.msra.mxu0 %v2888_v37 }
 0x132   :  { %2159 = vmatpush1.bf16.msra.mxu1 %v2891_v38  ;;  %2181 = vmatprep.subr.bf16.mxu0 %v2657_v18 }
 0x133   :  { %2185 = vmatprep.subr.bf16.mxu1 %v2811_v16 }
 0x135   :  { %568 = vmatmul.mubr.f32.vlgmr.msra.gmra.mrb[0].mxu1 %v2656_v17  ;;  %2183 = vmatpush3.bf16.msra.mxu0 %v2896_v42 }
 0x136   :  { %2216 = vmatprep.subr.bf16.mxu0 %v2657_v18  ;;  %2187 = vmatpush1.bf16.msra.mxu1 %v2819_v30 }
 0x137   :  { %2189 = vmatprep.subr.bf16.mxu1 %v2821_v32  ;;  %730 = vmatprep.mubr.f32.mxu1 %v2656_v17 }
 0x138   :  { %1887 = vmatmul.mubr.f32.vlgmr.msra.gmra.mrb[8].mxu0 %v2656_v17 }
 0x139   :  { %2218 = vmatpush3.bf16.msra.mxu0 %v2823_v41  ;;  %1921 = vmatprep.mubr.msk.f32.mxu0 %vm2658_vm2, %v2656_v17 }
 0x13a   :  { %2219 = vmatprep.subr.bf16.mxu0 %v2657_v18  ;;  %2191 = vmatpush1.bf16.msra.mxu1 %v2826_v43 }
 0x13b   :  { %2193 = vmatprep.subr.bf16.mxu1 %v2830_v46 }
 0x13d   :  { %2221 = vmatpush3.bf16.msra.mxu0 %v2833_v53 }
 0x13e   :  { %2222 = vmatprep.subr.bf16.mxu0 %v2657_v18  ;;  %2195 = vmatpush1.bf16.msra.mxu1 %v2836_v54 }
 0x13f   :  { %2197 = vmatprep.subr.bf16.mxu1 %v2840_v57 }
 0x141   :  { %2224 = vmatpush3.bf16.msra.mxu0 %v2846_v62 }
 0x142   :  { %2225 = vmatprep.subr.bf16.mxu0 %v2657_v18  ;;  %2199 = vmatpush1.bf16.msra.mxu1 %v2849_v63 }
 0x143   :  { %2201 = vmatprep.subr.bf16.mxu1 %v2853_v2 }
 0x145   :  { %2227 = vmatpush3.bf16.msra.mxu0 %v2857_v7 }
 0x146   :  { %2228 = vmatprep.subr.bf16.mxu0 %v2657_v18  ;;  %2203 = vmatpush1.bf16.msra.mxu1 %v2860_v8 }
 0x147   :  { %2205 = vmatprep.subr.bf16.mxu1 %v2864_v11 }
 0x149   :  { %2230 = vmatpush3.bf16.msra.mxu0 %v2868_v19 }
 0x14a   :  { %2231 = vmatprep.subr.bf16.mxu0 %v2657_v18  ;;  %2207 = vmatpush1.bf16.msra.mxu1 %v2871_v20 }
 0x14b   :  { %2209 = vmatprep.subr.bf16.mxu1 %v2875_v23 }
 0x14d   :  { %2233 = vmatpush3.bf16.msra.mxu0 %v2878_v28 }
 0x14e   :  { %2234 = vmatprep.subr.bf16.mxu0 %v2657_v18  ;;  %2211 = vmatpush1.bf16.msra.mxu1 %v2881_v29 }
 0x14f   :  { %2213 = vmatprep.subr.bf16.mxu1 %v2885_v34 }
 0x151   :  { %2236 = vmatpush3.bf16.msra.mxu0 %v2888_v37 }
 0x152   :  { %2237 = vmatprep.subr.bf16.mxu0 %v2657_v18  ;;  %2215 = vmatpush1.bf16.msra.mxu1 %v2891_v38 }
 0x153   :  { %2241 = vmatprep.subr.bf16.mxu1 %v2811_v16 }
 0x155   :  { %2239 = vmatpush3.bf16.msra.mxu0 %v2896_v42 }
 0x156   :  { %2272 = vmatprep.subr.bf16.mxu0 %v2657_v18 }
 0x1e9   :  { %v1850_v50 = vpop.f32.mrb[4].mxu0 }
 0x1ea   :  { %v2943_v51 = vadd.f32 %v1850_v50, %v270_v49  ;;  %v429_v52 = vpop.f32.mrb[5].mxu0 }
 0x1eb   :  { %v430_v27 = vadd.f32 %v429_v52, %v270_v49 }
 0x1ee   :  { %v1853_v55 = vpop.f32.mrb[6].mxu0 }
 0x1ef   :  { %v2945_v56 = vadd.f32 %v1853_v55, %v270_v49  ;;  %v439_v58 = vpop.f32.mrb[7].mxu0 }
 0x1f0   :  { %v2947_v59 = vadd.f32 %v439_v58, %v270_v49 }
 0x208   :  { %v569_v1 = vpop.f32.mrb[0].mxu1 }
 0x209   :  { %v2448_v4 = vadd.f32 %v569_v1, %v2949_v0  ;;  %v571_v5 = vpop.f32.mrb[1].mxu1 }
 0x20a   :  { %v2449_v10 = vadd.f32 %v571_v5, %v2951_v3 }
 0x20b   :  { %v1660_v6 = vmul.f32 -1.442695, %v2448_v4  ;;  %v640_v9 = vpop.f32.mrb[8].mxu0 }
 0x20c   :  { %v1888_v12 = vpop.f32.mrb[9].mxu0  ;;  %v1661_v13 = vmul.f32 -1.442695, %v2449_v10  ;;  %v658_v25 = vadd.f32 %v2958_v22, %v640_v9 }
 0x20d   :  { %2477 = vpow2.f32 %v1660_v6 }
 0x20e   :  { %2479 = vpow2.f32 %v1661_v13 }
 0x217   :  { %v2478_v14 = vpop.eup %2477 }
 0x218   :  { %v648_v15 = vadd.f32 1.0, %v2478_v14  ;;  %v2480_v21 = vpop.eup %2479 }
 0x219   :  { %v655_v24 = vadd.f32 1.0, %v2480_v21 }
 0x21a   :  { %2481 = vrcp.f32 %v648_v15 }
 0x21b   :  { %2483 = vrcp.f32 %v655_v24 }
 0x224   :  { %v2482_v26 = vpop.eup %2481 }
 0x225   :  { %v659_v31 = vmul.f32 %v2482_v26, %v658_v25  ;;  %v2484_v35 = vpop.eup %2483  ;;  %v1159_v25 = vld [vmem:[#allocation8] sm:$0xff]  ;;  %v1162_v26 = vld [vmem:[#allocation8 + $0x18] sm:$0xff] }
 0x226   :  { %v662_v36 = vsub.f32 1.0, %v2484_v35  ;;  %v664_v44 = vmul.f32 0.0, %v2484_v35  ;;  %v1166_v35 = vld [vmem:[#allocation8 + $0x38] sm:$0xff] }
 0x227   :  { %v660_v33 = vadd.f32 %v659_v31, %v430_v27  ;;  %v2354_v27 = vpack.c.bf16 %v1162_v26, %v1159_v25  ;;  %v1164_v31 = vld [vmem:[#allocation8 + $0x28] sm:$0xff] }
 0x228   :  { %v1200_v25 = vld [vmem:[#allocation8 + $0x148] sm:$0xff] }
 0x229   :  { %2485 = vtanh.f32 %v660_v33 }
 0x233   :  { %v2486_v39 = vpop.eup %2485 }
 0x234   :  { %v663_v40 = vmul.f32 %v2486_v39, %v662_v36  ;;  %v1169_v36 = vld [vmem:[#allocation8 + $0x50] sm:$0xff] }
 0x235   :  { %v2356_v39 = vpack.c.bf16 %v1169_v36, %v1166_v35  ;;  %v1204_v35 = vld [vmem:[#allocation8 + $0x168] sm:$0xff]  ;;  %v1203_v36 = vld [vmem:[#allocation8 + $0x160] sm:$0xff] }
 0x236   :  { %v665_v45 = vadd.f32 %v664_v44, %v663_v40  ;;  %v1165_v40 = vld [vmem:[#allocation8 + $0x30] sm:$0xff]  ;;  %v1168_v44 = vld [vmem:[#allocation8 + $0x48] sm:$0xff] }
 0x238   :  { %731 = vmatmul.mubr.f32.vlgmr.msra.gmra.mrb[2].mxu1 %v665_v45  ;;  %1922 = vmatmul.mubr.f32.vlgmr.msra.gmra.mrb[10].mxu0 %v665_v45 }
 0x239   :  { %2243 = vmatpush1.bf16.msra.mxu1 %v2819_v30  ;;  %2274 = vmatpush3.bf16.msra.mxu0 %v2823_v41 }
 0x23a   :  { %2245 = vmatprep.subr.bf16.mxu1 %v2821_v32  ;;  %2275 = vmatprep.subr.bf16.mxu0 %v2657_v18 }
 0x23b   :  { %893 = vmatprep.mubr.f32.mxu1 %v2656_v17  ;;  %1956 = vmatprep.mubr.msk.f32.mxu0 %vm2658_vm2, %v2656_v17 }
 0x23d   :  { %2247 = vmatpush1.bf16.msra.mxu1 %v2826_v43  ;;  %2277 = vmatpush3.bf16.msra.mxu0 %v2833_v53 }
 0x23e   :  { %2249 = vmatprep.subr.bf16.mxu1 %v2830_v46  ;;  %2278 = vmatprep.subr.bf16.mxu0 %v2657_v18 }
 0x241   :  { %2251 = vmatpush1.bf16.msra.mxu1 %v2836_v54  ;;  %2280 = vmatpush3.bf16.msra.mxu0 %v2846_v62 }
 0x242   :  { %2253 = vmatprep.subr.bf16.mxu1 %v2840_v57  ;;  %2281 = vmatprep.subr.bf16.mxu0 %v2657_v18 }
 0x245   :  { %2255 = vmatpush1.bf16.msra.mxu1 %v2849_v63  ;;  %2283 = vmatpush3.bf16.msra.mxu0 %v2857_v7 }
 0x246   :  { %2257 = vmatprep.subr.bf16.mxu1 %v2853_v2  ;;  %2284 = vmatprep.subr.bf16.mxu0 %v2657_v18 }
 0x249   :  { %2259 = vmatpush1.bf16.msra.mxu1 %v2860_v8  ;;  %2286 = vmatpush3.bf16.msra.mxu0 %v2868_v19 }
 0x24a   :  { %2261 = vmatprep.subr.bf16.mxu1 %v2864_v11  ;;  %2287 = vmatprep.subr.bf16.mxu0 %v2657_v18 }
 0x24d   :  { %2263 = vmatpush1.bf16.msra.mxu1 %v2871_v20  ;;  %2289 = vmatpush3.bf16.msra.mxu0 %v2878_v28 }
 0x24e   :  { %2265 = vmatprep.subr.bf16.mxu1 %v2875_v23  ;;  %2290 = vmatprep.subr.bf16.mxu0 %v2657_v18 }
 0x251   :  { %2267 = vmatpush1.bf16.msra.mxu1 %v2881_v29  ;;  %2292 = vmatpush3.bf16.msra.mxu0 %v2888_v37 }
 0x252   :  { %2269 = vmatprep.subr.bf16.mxu1 %v2885_v34  ;;  %2293 = vmatprep.subr.bf16.mxu0 %v2657_v18 }
 0x255   :  { %2271 = vmatpush1.bf16.msra.mxu1 %v2891_v38  ;;  %2295 = vmatpush3.bf16.msra.mxu0 %v2896_v42 }
 0x256   :  { %2297 = vmatprep.subr.bf16.mxu1 %v2811_v16  ;;  %2328 = vmatprep.subr.bf16.mxu0 %v2657_v18 }
 0x30b   :  { %v732_v47 = vpop.f32.mrb[2].mxu1  ;;  %v803_v48 = vpop.f32.mrb[10].mxu0 }
 0x30c   :  { %v2450_v49 = vadd.f32 %v732_v47, %v2949_v0  ;;  %v734_v50 = vpop.f32.mrb[3].mxu1  ;;  %v1923_v52 = vpop.f32.mrb[11].mxu0  ;;  %v821_v16 = vadd.f32 %v2958_v22, %v803_v48  ;;  %v2358_v47 = vpack.c.bf16 %v1168_v44, %v1165_v40  ;;  %v1170_v48 = vld [vmem:[#allocation8 + $0x58] sm:$0xff] }
 0x30d   :  { %v2451_v58 = vadd.f32 %v734_v50, %v2951_v3  ;;  %v1172_v50 = vld [vmem:[#allocation8 + $0x68] sm:$0xff]  ;;  %v1175_v52 = vld [vmem:[#allocation8 + $0x80] sm:$0xff]  ;;  %v1206_v40 = vld [vmem:[#allocation8 + $0x178] sm:$0xff] }
 0x30e   :  { %v1662_v55 = vmul.f32 -1.442695, %v2450_v49  ;;  %v2412_v44 = vpack.c.bf16 %v1206_v40, %v1203_v36 }
 0x30f   :  { %v1663_v60 = vmul.f32 -1.442695, %v2451_v58  ;;  %v1171_v58 = vld [vmem:[#allocation8 + $0x60] sm:$0xff] }
 0x310   :  { %2487 = vpow2.f32 %v1662_v55  ;;  %v2360_v55 = vpack.c.bf16 %v1175_v52, %v1172_v50 }
 0x311   :  { %2489 = vpow2.f32 %v1663_v60  ;;  %v1174_v60 = vld [vmem:[#allocation8 + $0x78] sm:$0xff] }
 0x31a   :  { %v2488_v61 = vpop.eup %2487 }
 0x31b   :  { %v811_v1 = vadd.f32 1.0, %v2488_v61  ;;  %v2490_v4 = vpop.eup %2489  ;;  %v1173_v61 = vld [vmem:[#allocation8 + $0x70] sm:$0xff] }
 0x31c   :  { %v818_v5 = vadd.f32 1.0, %v2490_v4  ;;  %v1176_v4 = vld [vmem:[#allocation8 + $0x88] sm:$0xff] }
 0x31d   :  { %2491 = vrcp.f32 %v811_v1  ;;  %v2362_v1 = vpack.c.bf16 %v1174_v60, %v1171_v58 }
 0x31e   :  { %2493 = vrcp.f32 %v818_v5  ;;  %v2392_v5 = vpack.c.bf16 %v1176_v4, %v1173_v61 }
 0x327   :  { %v2492_v6 = vpop.eup %2491 }
 0x328   :  { %v822_v9 = vmul.f32 %v2492_v6, %v821_v16  ;;  %v2494_v12 = vpop.eup %2493  ;;  %v1178_v16 = vld [vmem:[#allocation8 + $0x98] sm:$0xff]  ;;  %v1181_v6 = vld [vmem:[#allocation8 + $0xb0] sm:$0xff] }
 0x329   :  { %v825_v13 = vsub.f32 1.0, %v2494_v12  ;;  %v827_v21 = vmul.f32 %v2494_v12, %v665_v45  ;;  %v1167_v45 = vld [vmem:[#allocation8 + $0x40] sm:$0xff]  ;;  %v1180_v12 = vld [vmem:[#allocation8 + $0xa8] sm:$0xff] }
 0x32a   :  { %v823_v10 = vadd.f32 %v822_v9, %v2943_v51  ;;  %v2388_v49 = vpack.c.bf16 %v1170_v48, %v1167_v45  ;;  %v2364_v9 = vpack.c.bf16 %v1181_v6, %v1178_v16 }
 0x32c   :  { %2495 = vtanh.f32 %v823_v10  ;;  %v1177_v10 = vld [vmem:[#allocation8 + $0x90] sm:$0xff] }
 0x336   :  { %v2496_v14 = vpop.eup %2495 }
 0x337   :  { %v826_v15 = vmul.f32 %v2496_v14, %v825_v13  ;;  %v1179_v13 = vld [vmem:[#allocation8 + $0xa0] sm:$0xff]  ;;  %v2366_v14 = vpack.c.bf16 %v1180_v12, %v1177_v10 }
 0x339   :  { %v828_v24 = vadd.f32 %v827_v21, %v826_v15  ;;  %v1182_v15 = vld [vmem:[#allocation8 + $0xb8] sm:$0xff] }
 0x33a   :  { %v2396_v21 = vpack.c.bf16 %v1182_v15, %v1179_v13  ;;  %v1481_v15 = vld [vmem:[%s3150_s10 + $0x10] sm:$0xff] }
 0x33b   :  { %894 = vmatmul.mubr.f32.vlgmr.msra.gmra.mrb[4].mxu1 %v828_v24  ;;  %1957 = vmatmul.mubr.f32.vlgmr.msra.gmra.mrb[12].mxu0 %v828_v24 }
 0x33c   :  { %2299 = vmatpush1.bf16.msra.mxu1 %v2819_v30  ;;  %2330 = vmatpush3.bf16.msra.mxu0 %v2823_v41 }
 0x33d   :  { %2301 = vmatprep.subr.bf16.mxu1 %v2821_v32  ;;  %2331 = vmatprep.subr.bf16.mxu0 %v2657_v18 }
 0x33e   :  { %1056 = vmatprep.mubr.f32.mxu1 %v2656_v17  ;;  %1991 = vmatprep.mubr.msk.f32.mxu0 %vm2658_vm2, %v2656_v17 }
 0x340   :  { %2303 = vmatpush1.bf16.msra.mxu1 %v2826_v43  ;;  %2333 = vmatpush3.bf16.msra.mxu0 %v2833_v53 }
 0x341   :  { %2305 = vmatprep.subr.bf16.mxu1 %v2830_v46  ;;  %2334 = vmatprep.subr.bf16.mxu0 %v2657_v18 }
 0x344   :  { %2307 = vmatpush1.bf16.msra.mxu1 %v2836_v54  ;;  %2336 = vmatpush3.bf16.msra.mxu0 %v2846_v62 }
 0x345   :  { %2309 = vmatprep.subr.bf16.mxu1 %v2840_v57  ;;  %2337 = vmatprep.subr.bf16.mxu0 %v2657_v18 }
 0x348   :  { %2311 = vmatpush1.bf16.msra.mxu1 %v2849_v63  ;;  %2339 = vmatpush3.bf16.msra.mxu0 %v2857_v7 }
 0x349   :  { %2313 = vmatprep.subr.bf16.mxu1 %v2853_v2  ;;  %2340 = vmatprep.subr.bf16.mxu0 %v2657_v18 }
 0x34c   :  { %2315 = vmatpush1.bf16.msra.mxu1 %v2860_v8  ;;  %2342 = vmatpush3.bf16.msra.mxu0 %v2868_v19 }
 0x34d   :  { %2317 = vmatprep.subr.bf16.mxu1 %v2864_v11  ;;  %2343 = vmatprep.subr.bf16.mxu0 %v2657_v18 }
 0x350   :  { %2319 = vmatpush1.bf16.msra.mxu1 %v2871_v20  ;;  %2345 = vmatpush3.bf16.msra.mxu0 %v2878_v28 }
 0x351   :  { %2321 = vmatprep.subr.bf16.mxu1 %v2875_v23  ;;  %2346 = vmatprep.subr.bf16.mxu0 %v2657_v18 }
 0x354   :  { %2323 = vmatpush1.bf16.msra.mxu1 %v2881_v29  ;;  %2348 = vmatpush3.bf16.msra.mxu0 %v2888_v37 }
 0x355   :  { %2325 = vmatprep.subr.bf16.mxu1 %v2885_v34  ;;  %2349 = vmatprep.subr.bf16.mxu0 %v2657_v18 }
 0x358   :  { %2327 = vmatpush1.bf16.msra.mxu1 %v2891_v38  ;;  %2351 = vmatpush3.bf16.msra.mxu0 %v2896_v42  ;;  %v1160_v38 = vld [vmem:[#allocation8 + $0x8] sm:$0xff]  ;;  %v1163_v42 = vld [vmem:[#allocation8 + $0x20] sm:$0xff] }
 0x359   :  { %v2352_v51 = vpack.c.bf16 %v1163_v42, %v1160_v38  ;;  %v1198_v38 = vld [vmem:[#allocation8 + $0x138] sm:$0xff]  ;;  %v1197_v42 = vld [vmem:[#allocation8 + $0x130] sm:$0xff] }
 0x35a   :  { %v2408_v26 = vpack.c.bf16 %v1200_v25, %v1197_v42  ;;  %v1157_v42 = vld [vmem:[%s3147_s7 + $0xc] sm:$0xff] }
 0x35b   :  { %2353 = vmatprep.subr.bf16.mxu1 %v2352_v51  ;;  %v1397_v36 = vrot.slane %v1157_v42, 4 }
 0x40e   :  { %v895_v30 = vpop.f32.mrb[4].mxu1  ;;  %v966_v32 = vpop.f32.mrb[12].mxu0 }
 0x40f   :  { %v2452_v41 = vadd.f32 %v895_v30, %v2949_v0  ;;  %v897_v43 = vpop.f32.mrb[5].mxu1  ;;  %v1958_v46 = vpop.f32.mrb[13].mxu0  ;;  %v984_v7 = vadd.f32 %v2958_v22, %v966_v32  ;;  %v1187_v30 = vld [vmem:[#allocation8 + $0xe0] sm:$0xff] }
 0x410   :  { %v2453_v54 = vadd.f32 %v897_v43, %v2951_v3  ;;  %v1186_v43 = vld [vmem:[#allocation8 + $0xd8] sm:$0xff]  ;;  %v1185_v46 = vld [vmem:[#allocation8 + $0xd0] sm:$0xff] }
 0x411   :  { %v1664_v53 = vmul.f32 -1.442695, %v2452_v41  ;;  %v1183_v41 = vld [vmem:[#allocation8 + $0xc0] sm:$0xff] }
 0x412   :  { %v1665_v57 = vmul.f32 -1.442695, %v2453_v54  ;;  %v1188_v54 = vld [vmem:[#allocation8 + $0xe8] sm:$0xff] }
 0x413   :  { %2497 = vpow2.f32 %v1664_v53  ;;  %v2370_v53 = vpack.c.bf16 %v1186_v43, %v1183_v41  ;;  %v1485_v41 = vld [vmem:[%s3150_s10 + $0x30] sm:$0xff]  ;;  %v1486_v43 = vld [vmem:[%s3150_s10 + $0x38] sm:$0xff] }
 0x414   :  { %2499 = vpow2.f32 %v1665_v57  ;;  %v2400_v57 = vpack.c.bf16 %v1188_v54, %v1185_v46  ;;  %v2428_v46 = vpack.c.bf16 %v1486_v43, %v1485_v41  ;;  %v1488_v54 = vld [vmem:[%s3150_s10 + $0x48] sm:$0xff] }
 0x415   :  { %v1156_v43 = vld [vmem:[%s3147_s7 + $0x8] sm:$0xf] }
 0x41d   :  { %v2498_v62 = vpop.eup %2497 }
 0x41e   :  { %v974_v63 = vadd.f32 1.0, %v2498_v62  ;;  %v2500_v18 = vpop.eup %2499  ;;  %v1190_v62 = vld [vmem:[#allocation8 + $0xf8] sm:$0xff] }
 0x41f   :  { %v981_v2 = vadd.f32 1.0, %v2500_v18 }
 0x420   :  { %2501 = vrcp.f32 %v974_v63  ;;  %v1193_v63 = vld [vmem:[#allocation8 + $0x110] sm:$0xff] }
 0x421   :  { %2503 = vrcp.f32 %v981_v2  ;;  %v2372_v18 = vpack.c.bf16 %v1193_v63, %v1190_v62  ;;  %v1189_v2 = vld [vmem:[#allocation8 + $0xf0] sm:$0xff] }
 0x422   :  { %v1490_v63 = vld [vmem:[%s3150_s10 + $0x58] sm:$0xff] }
 0x42a   :  { %v2502_v8 = vpop.eup %2501 }
 0x42b   :  { %v985_v11 = vmul.f32 %v2502_v8, %v984_v7  ;;  %v2504_v20 = vpop.eup %2503  ;;  %v1192_v7 = vld [vmem:[#allocation8 + $0x108] sm:$0xff]  ;;  %v1191_v8 = vld [vmem:[#allocation8 + $0x100] sm:$0xff] }
 0x42c   :  { %v988_v23 = vsub.f32 1.0, %v2504_v20  ;;  %v990_v34 = vmul.f32 %v2504_v20, %v828_v24  ;;  %v1184_v24 = vld [vmem:[#allocation8 + $0xc8] sm:$0xff] }
 0x42d   :  { %v986_v19 = vadd.f32 %v985_v11, %v2947_v59  ;;  %v1161_v59 = vld [vmem:[#allocation8 + $0x10] sm:$0xff]  ;;  %v2368_v32 = vpack.c.bf16 %v1187_v30, %v1184_v24  ;;  %v2374_v11 = vpack.c.bf16 %v1192_v7, %v1189_v2  ;;  %v1483_v24 = vld [vmem:[%s3150_s10 + $0x20] sm:$0xff]  ;;  %v1484_v30 = vld [vmem:[%s3150_s10 + $0x28] sm:$0xff] }
 0x42e   :  { %v2384_v33 = vpack.c.bf16 %v1164_v31, %v1161_v59  ;;  %v1202_v59 = vld [vmem:[#allocation8 + $0x158] sm:$0xff]  ;;  %v1492_v7 = vld [vmem:[%s3150_s10 + $0x68] sm:$0xff] }
 0x42f   :  { %2505 = vtanh.f32 %v986_v19  ;;  %v1194_v19 = vld [vmem:[#allocation8 + $0x118] sm:$0xff] }
 0x430   :  { %2385 = vmatprep.subr.bf16.mxu0 %v2384_v33  ;;  %v2404_v20 = vpack.c.bf16 %v1194_v19, %v1191_v8  ;;  %v1491_v2 = vld [vmem:[%s3150_s10 + $0x60] sm:$0xff]  ;;  %v1494_v19 = vld [vmem:[%s3150_s10 + $0x78] sm:$0xff] }
 0x431   :  { %v2440_v8 = vpack.c.bf16 %v1492_v7, %v1491_v2 }
 0x439   :  { %v2506_v28 = vpop.eup %2505 }
 0x43a   :  { %v989_v29 = vmul.f32 %v2506_v28, %v988_v23  ;;  %v1196_v23 = vld [vmem:[#allocation8 + $0x128] sm:$0xff]  ;;  %v1199_v28 = vld [vmem:[#allocation8 + $0x140] sm:$0xff] }
 0x43c   :  { %v3037_v37 = vadd.f32 %v990_v34, %v989_v29  ;;  %v2376_v29 = vpack.c.bf16 %v1199_v28, %v1196_v23  ;;  %v1195_v34 = vld [vmem:[#allocation8 + $0x120] sm:$0xff]  ;;  %v2659_v28 = vmov 0  }
 0x43d   :  { %v2378_v51 = vpack.c.bf16 %v1198_v38, %v1195_v34  ;;  %v1593_v23 = vld [vmem:[%s3152_s12] sm:$0xf]  ;;  %2475 = vset.pattern.permute.xlu0 %v2659_v28  ;;  %2476 = vset.pattern.permute.xlu1 %v2659_v28 }
 0x43e   :  { %1057 = vmatmul.mubr.f32.vlgmr.msra.gmra.mrb[6].mxu1 %v3037_v37  ;;  %1992 = vmatmul.mubr.f32.vlgmr.msra.gmra.mrb[14].mxu0 %v3037_v37 }
 0x43f   :  { %1272 = vmatprep.mubr.f32.mxu1 %v2656_v17  ;;  %2355 = vmatpush1.bf16.msra.mxu1 %v2354_v27  ;;  %v1205_v27 = vld [vmem:[#allocation8 + $0x170] sm:$0xff] }
 0x440   :  { %2387 = vmatpush3.bf16.msra.mxu0 %v2384_v33  ;;  %2357 = vmatprep.subr.bf16.mxu1 %v2356_v39  ;;  %v2380_v31 = vpack.c.bf16 %v1205_v27, %v1202_v59  ;;  %v1201_v33 = vld [vmem:[#allocation8 + $0x150] sm:$0xff] }
 0x441   :  { %2389 = vmatprep.subr.bf16.mxu0 %v2388_v49  ;;  %v2382_v39 = vpack.c.bf16 %v1204_v35, %v1201_v33  ;;  %1596 = vperm.xlu0 %2475, %v1593_v23  }
 0x443   :  { %2359 = vmatpush1.bf16.msra.mxu1 %v2358_v47 }
 0x444   :  { %2391 = vmatpush3.bf16.msra.mxu0 %v2388_v49  ;;  %2361 = vmatprep.subr.bf16.mxu1 %v2360_v55 }
 0x445   :  { %2393 = vmatprep.subr.bf16.mxu0 %v2392_v5 }
 0x447   :  { %2363 = vmatpush1.bf16.msra.mxu1 %v2362_v1 }
 0x448   :  { %2395 = vmatpush3.bf16.msra.mxu0 %v2392_v5  ;;  %2365 = vmatprep.subr.bf16.mxu1 %v2364_v9 }
 0x449   :  { %2397 = vmatprep.subr.bf16.mxu0 %v2396_v21 }
 0x44b   :  { %2367 = vmatpush1.bf16.msra.mxu1 %v2366_v14 }
 0x44c   :  { %2399 = vmatpush3.bf16.msra.mxu0 %v2396_v21  ;;  %2369 = vmatprep.subr.bf16.mxu1 %v2368_v32  ;;  %v2424_v32 = vpack.c.bf16 %v1484_v30, %v1483_v24 }
 0x44d   :  { %2401 = vmatprep.subr.bf16.mxu0 %v2400_v57 }
 0x44f   :  { %2371 = vmatpush1.bf16.msra.mxu1 %v2370_v53  ;;  %v1487_v53 = vld [vmem:[%s3150_s10 + $0x40] sm:$0xff] }
 0x450   :  { %2403 = vmatpush3.bf16.msra.mxu0 %v2400_v57  ;;  %2373 = vmatprep.subr.bf16.mxu1 %v2372_v18  ;;  %v1489_v57 = vld [vmem:[%s3150_s10 + $0x50] sm:$0xff]  ;;  %v2432_v62 = vpack.c.bf16 %v1488_v54, %v1487_v53 }
 0x451   :  { %2405 = vmatprep.subr.bf16.mxu0 %v2404_v20  ;;  %v2436_v18 = vpack.c.bf16 %v1490_v63, %v1489_v57 }
 0x453   :  { %2375 = vmatpush1.bf16.msra.mxu1 %v2374_v11  ;;  %v1493_v11 = vld [vmem:[%s3150_s10 + $0x70] sm:$0xff] }
 0x454   :  { %2407 = vmatpush3.bf16.msra.mxu0 %v2404_v20  ;;  %2377 = vmatprep.subr.bf16.mxu1 %v2376_v29  ;;  %v2444_v20 = vpack.c.bf16 %v1494_v19, %v1493_v11  ;;  %v1155_v29 = vld [vmem:[%s3147_s7] sm:$0xff]  ;;  %v1158_v19 = vld [vmem:[%s3147_s7 + $0x14] sm:$0xf] }
 0x455   :  { %2409 = vmatprep.subr.bf16.mxu0 %v2408_v26  ;;  %v1396_v38 = vrot.slane %v1155_v29, 4 }
 0x457   :  { %2379 = vmatpush1.bf16.msra.mxu1 %v2378_v51 }
 0x458   :  { %2411 = vmatpush3.bf16.msra.mxu0 %v2408_v26  ;;  %2381 = vmatprep.subr.bf16.mxu1 %v2380_v31 }
 0x459   :  { %2413 = vmatprep.subr.bf16.mxu0 %v2412_v44 }
 0x45b   :  { %2383 = vmatpush1.bf16.msra.mxu1 %v2382_v39 }
 0x45c   :  { %2415 = vmatpush3.bf16.msra.mxu0 %v2412_v44 }
 0x511   :  { %v1058_v45 = vpop.f32.mrb[6].mxu1  ;;  %v1129_v47 = vpop.f32.mrb[14].mxu0 }
 0x512   :  { %v2454_v48 = vadd.f32 %v1058_v45, %v2949_v0  ;;  %v1060_v49 = vpop.f32.mrb[7].mxu1  ;;  %v1993_v50 = vpop.f32.mrb[15].mxu0  ;;  %v1147_v5 = vadd.f32 %v2958_v22, %v1129_v47  ;;  %v1480_v22 = vld [vmem:[%s3150_s10 + $0x8] sm:$0xff] }
 0x513   :  { %v2455_v55 = vadd.f32 %v1060_v49, %v2951_v3 }
 0x514   :  { %v1666_v52 = vmul.f32 -1.442695, %v2454_v48 }
 0x515   :  { %v1667_v58 = vmul.f32 -1.442695, %v2455_v55 }
 0x516   :  { %2507 = vpow2.f32 %v1666_v52 }
 0x517   :  { %2509 = vpow2.f32 %v1667_v58 }
 0x520   :  { %v2508_v60 = vpop.eup %2507 }
 0x521   :  { %v1137_v61 = vadd.f32 1.0, %v2508_v60  ;;  %v2510_v1 = vpop.eup %2509 }
 0x522   :  { %v1144_v4 = vadd.f32 1.0, %v2510_v1 }
 0x523   :  { %2511 = vrcp.f32 %v1137_v61 }
 0x524   :  { %2513 = vrcp.f32 %v1144_v4 }
 0x52d   :  { %v2512_v16 = vpop.eup %2511 }
 0x52e   :  { %v1148_v6 = vmul.f32 %v2512_v16, %v1147_v5  ;;  %v2514_v9 = vpop.eup %2513 }
 0x52f   :  { %v1151_v10 = vsub.f32 1.0, %v2514_v9  ;;  %v1153_v13 = vmul.f32 %v2514_v9, %v3037_v37 }
 0x530   :  { %v1149_v0 = vadd.f32 %v1148_v6, %v2945_v56  ;;  %v1479_v56 = vld [vmem:[%s3150_s10] sm:$0xff] }
 0x531   :  { %v2416_v37 = vpack.c.bf16 %v1480_v22, %v1479_v56  ;;  %v1676_v22 = vld [vmem:[%s3149_s9] ss:$0 sm:$0xff] }
 0x532   :  { %2515 = vtanh.f32 %v1149_v0 }
 0x533   :  { %2417 = vmatprep.subr.bf16.mxu1 %v2416_v37 }
 0x53c   :  { %v2516_v12 = vpop.eup %2515 }
 0x53d   :  { %v1152_v3 = vmul.f32 %v2516_v12, %v1151_v10 }
 0x53f   :  { %v3047_v14 = vadd.f32 %v1153_v13, %v1152_v3 }
 0x541   :  { %1273 = vmatmul.mubr.f32.vlgmr.msra.gmra.mrb[8].mxu1 %v3047_v14  ;;  %2026 = vmatprep.mubr.f32.mxu0 %v3047_v14 }
 0x542   :  { %2027 = vmatmul.mubr.f32.vlgmr.msra.gmra.mrb[16].mxu0 %v3047_v14  ;;  %1278 = vmatprep.mubr.f32.mxu1 %v2656_v17  ;;  %v1482_v17 = vld [vmem:[%s3150_s10 + $0x18] sm:$0xff] }
 0x543   :  { %2419 = vmatpush3.bf16.msra.mxu1 %v2416_v37  ;;  %v2420_v21 = vpack.c.bf16 %v1482_v17, %v1481_v15 }
 0x545   :  { %1279 = vmatmul.mubr.f32.gmra.mrb[10].mxu1 %v3047_v14  ;;  %2421 = vmatprep.subr.bf16.mxu1 %v2420_v21 }
 0x547   :  { %2423 = vmatpush3.bf16.msra.mxu1 %v2420_v21 }
 0x548   :  { %2425 = vmatprep.subr.bf16.mxu1 %v2424_v32 }
 0x54b   :  { %2427 = vmatpush3.bf16.msra.mxu1 %v2424_v32 }
 0x54c   :  { %2429 = vmatprep.subr.bf16.mxu1 %v2428_v46 }
 0x54f   :  { %2431 = vmatpush3.bf16.msra.mxu1 %v2428_v46 }
 0x550   :  { %2433 = vmatprep.subr.bf16.mxu1 %v2432_v62 }
 0x553   :  { %2435 = vmatpush3.bf16.msra.mxu1 %v2432_v62 }
 0x554   :  { %2437 = vmatprep.subr.bf16.mxu1 %v2436_v18 }
 0x557   :  { %2439 = vmatpush3.bf16.msra.mxu1 %v2436_v18 }
 0x558   :  { %2441 = vmatprep.subr.bf16.mxu1 %v2440_v8 }
 0x55b   :  { %2443 = vmatpush3.bf16.msra.mxu1 %v2440_v8 }
 0x55c   :  { %2445 = vmatprep.subr.bf16.mxu1 %v2444_v20 }
 0x55f   :  { %2447 = vmatpush3.bf16.msra.mxu1 %v2444_v20 }
 0x614   :  { %v1274_v34 = vpop.f32.mrb[8].mxu1 }
 0x615   :  { %v1362_v51 = vcombine.high %v1274_v34, %v1274_v34  ;;  %v1366_v25 = vadd.f32 %v1274_v34, %v1155_v29  ;;  %v1276_v26 = vpop.f32.mrb[9].mxu1  ;;  %v2028_v59 = vpop.f32.mrb[16].mxu0 }
 0x616   :  { %v1402_v27 = vcombine.high %v1276_v26, %v1276_v26  ;;  %v1351_v31 = vpop.f32.mrb[17].mxu0  ;;  %v1406_v39 = vadd.f32 %v1396_v38, %v1276_v26  ;;  %v1441_v53 = vadd.f32 %v2028_v59, %v1676_v22 }
 0x617   :  { %v1367_v33 = vadd.f32 %v1362_v51, %v1155_v29  ;;  %v1668_v35 = vmul.f32 -1.442695, %v1366_v25  ;;  %v1440_v24 = vadd.f32 %v1676_v22, %v1351_v31 }
 0x618   :  { %v1280_v40 = vpop.f32.mrb[10].mxu1  ;;  %v1407_v48 = vadd.f32 %v1402_v27, %v1396_v38  ;;  %v1672_v58 = vmul.f32 -1.442695, %v1406_v39  ;;  %v1445_v8 = vcombine.high %v1441_v53, %v1441_v53 }
 0x619   :  { %2517 = vpow2.f32 %v1668_v35  ;;  %v1669_v44 = vmul.f32 -1.442695, %v1367_v33  ;;  %v1363_v45 = vcombine.high %v1280_v40, %v1280_v40  ;;  %v1282_v47 = vpop.f32.mrb[11].mxu1  ;;  %v1368_v49 = vadd.f32 %v1280_v40, %v1157_v42 }
 0x61a   :  { %v1403_v50 = vcombine.high %v1282_v47, %v1282_v47  ;;  %v1408_v55 = vadd.f32 %v1397_v36, %v1282_v47  ;;  %v1673_v4 = vmul.f32 -1.442695, %v1407_v48  ;;  %v1444_v54 = vcombine.high %v1440_v24, %v1440_v24 }
 0x61b   :  { %2519 = vpow2.f32 %v1669_v44  ;;  %v1369_v52 = vadd.f32 %v1363_v45, %v1157_v42  ;;  %v1670_v60 = vmul.f32 -1.442695, %v1368_v49  ;;  %v1469_v33 = vcombine.high %v3047_v14, %v3047_v14 }
 0x61c   :  { %v1409_v1 = vadd.f32 %v1403_v50, %v1397_v36  ;;  %v1674_v5 = vmul.f32 -1.442695, %v1408_v55 }
 0x61d   :  { %v1671_v61 = vmul.f32 -1.442695, %v1369_v52  ;;  %2521 = vpow2.f32 %v1670_v60 }
 0x61e   :  { %v1675_v16 = vmul.f32 -1.442695, %v1409_v1 }
 0x61f   :  { %2523 = vpow2.f32 %v1671_v61 }
 0x620   :  { %2525 = vpow2.f32 %v1672_v58 }
 0x621   :  { %2527 = vpow2.f32 %v1673_v4 }
 0x622   :  { %2529 = vpow2.f32 %v1674_v5 }
 0x623   :  { %v2518_v6 = vpop.eup %2517  ;;  %2531 = vpow2.f32 %v1675_v16  ;;  %v1678_v16 = vld [vmem:[#allocation2] ss:$0 sm:$0xff] }
 0x624   :  { %v1382_v0 = vadd.f32 1.0, %v2518_v6  ;;  %1623 = vperm.xlu1 %2476, %v1678_v16   ;;  %v1677_v6 = vld [vmem:[%s3151_s11] ss:$0 sm:$0xff]  ;;  %s2661_s11 = smov [#allocation9]  }
 0x625   :  { %v2520_v9 = vpop.eup %2519  ;;  %s1643_s24 = sshll.u32 %s2661_s11, 4  ;;  %s1644_s24 = int_to_ptr.vmem [resolvable:$true] %s1643_s24 }
 0x626   :  { %v1383_v10 = vadd.f32 1.0, %v2520_v9  ;;  %2533 = vrcp.f32 %v1382_v0  ;;  %s2623_s0 = scalar_lea.vmem %s1644_s24, 32  ;;  %p2628_p11 = scmp.lt.s32.totalorder %s1644_s24, %s1644_s24 }
 0x627   :  { %v2522_v12 = vpop.eup %2521  ;;  %p2624_p10 = scmp.ne.s32.totalorder %s1644_s24, %s2623_s0  ;;  %p2629_p12 = scmp.lt.s32.totalorder %s2623_s0, %s2623_s0 }
 0x628   :  { %2535 = vrcp.f32 %v1383_v10  ;;  %v1384_v13 = vadd.f32 1.0, %v2522_v12 }
 0x629   :  { %v2524_v3 = vpop.eup %2523  ;;  %p2630_p13 = por %p2629_p12, %p2628_p11 }
 0x62a   :  { %v2526_v56 = vpop.eup %2525  ;;  %v1385_v37 = vadd.f32 1.0, %v2524_v3  ;;  %2537 = vrcp.f32 %v1384_v13 }
 0x62b   :  { %v2528_v15 = vpop.eup %2527  ;;  %v1422_v21 = vadd.f32 1.0, %v2526_v56  ;;  %p2631_p0 = pnand %p2630_p13, %p2624_p10 }
 0x62c   :  { %2539 = vrcp.f32 %v1385_v37  ;;  %v2530_v17 = vpop.eup %2529  ;;  %v1423_v32 = vadd.f32 1.0, %v2528_v15 }
 0x62d   :  { %v2532_v30 = vpop.eup %2531  ;;  %v1424_v46 = vadd.f32 1.0, %v2530_v17  ;;  %2541 = vrcp.f32 %v1422_v21 }
 0x62e   :  { %v1425_v63 = vadd.f32 1.0, %v2532_v30  ;;  %2543 = vrcp.f32 %v1423_v32 }
 0x62f   :  { %2545 = vrcp.f32 %v1424_v46 }
 0x630   :  { %v2534_v41 = vpop.eup %2533 }
 0x631   :  { %v1448_v57 = vmul.f32 %v2534_v41, %v1440_v24 }
 0x632   :  { %v2536_v62 = vpop.eup %2535 }
 0x633   :  { %v1449_v18 = vmul.f32 %v2536_v62, %v1444_v54  ;;  %v1452_v2 = vadd.f32 %v1448_v57, %v1156_v43 }
 0x634   :  { %v2538_v7 = vpop.eup %2537 }
 0x635   :  { %v1453_v11 = vadd.f32 %v1449_v18, %v1156_v43  ;;  %2547 = vtanh.f32 %v1452_v2  ;;  %v1450_v23 = vmul.f32 %v2538_v7, %v1441_v53 }
 0x636   :  { %v2540_v20 = vpop.eup %2539  ;;  %2549 = vrcp.f32 %v1425_v63 }
 0x637   :  { %2551 = vtanh.f32 %v1453_v11  ;;  %v1451_v28 = vmul.f32 %v2540_v20, %v1445_v8  ;;  %v1454_v29 = vadd.f32 %v1450_v23, %v1158_v19  ;;  %v2542_v38 = vpop.eup %2541 }
 0x638   :  { %v2544_v42 = vpop.eup %2543  ;;  %v1460_v25 = vsub.f32 1.0, %v2542_v38  ;;  %v1471_v35 = vmul.f32 %v2542_v38, %v3047_v14 }
 0x639   :  { %v1455_v34 = vadd.f32 %v1451_v28, %v1158_v19  ;;  %2553 = vtanh.f32 %v1454_v29  ;;  %v2546_v51 = vpop.eup %2545  ;;  %v1461_v27 = vsub.f32 1.0, %v2544_v42  ;;  %v1472_v40 = vmul.f32 %v2544_v42, %v1469_v33 }
 0x63a   :  { %v1462_v45 = vsub.f32 1.0, %v2546_v51  ;;  %v1473_v55 = vmul.f32 %v2546_v51, %v3047_v14  ;;  %v1597_v14 = vpop.permute.xlu0 %1596 }
 0x63b   :  { %2555 = vtanh.f32 %v1455_v34 }
 0x63f   :  { %v2548_v26 = vpop.eup %2547 }
 0x640   :  { %v2550_v59 = vpop.eup %2549  ;;  %v1464_v31 = vmul.f32 %v2548_v26, %v1460_v25 }
 0x641   :  { %v2552_v36 = vpop.eup %2551  ;;  %v1463_v49 = vsub.f32 1.0, %v2550_v59  ;;  %v1474_v58 = vmul.f32 %v2550_v59, %v1469_v33 }
 0x642   :  { %v1465_v39 = vmul.f32 %v2552_v36, %v1461_v27  ;;  %v1475_v44 = vadd.f32 %v1471_v35, %v1464_v31 }
 0x643   :  { %v2554_v47 = vpop.eup %2553 }
 0x644   :  { %v1476_v48 = vadd.f32 %v1472_v40, %v1465_v39  ;;  %v1466_v52 = vmul.f32 %v2554_v47, %v1462_v45 }
 0x645   :  { %v2556_v50 = vpop.eup %2555 }
 0x646   :  { %v1506_v60 = vcombine.low %v1475_v44, %v1476_v48  ;;  %v1467_v61 = vmul.f32 %v2556_v50, %v1463_v49  ;;  %v1477_v1 = vadd.f32 %v1473_v55, %v1466_v52 }
 0x648   :  { %2061 = vmatprep.mubr.f32.mxu1 %v1506_v60  ;;  %v1478_v4 = vadd.f32 %v1474_v58, %v1467_v61 }
 0x64a   :  { %v1507_v5 = vcombine.low %v1477_v1, %v1478_v4 }
 0x64c   :  { %2062 = vmatmul.mubr.f32.vlgmr.msra.gmra.mrb[12].mxu1 %v1507_v5 }
 0x6a3   :  { %v1624_v57 = vpop.permute.xlu1 %1623 }
 0x71f   :  { %v2063_v0 = vpop.f32.mrb[12].mxu1 }
 0x720   :  { %v1582_v9 = vadd.f32 %v2063_v0, %v1677_v6  ;;  %v1576_v10 = vpop.f32.mrb[13].mxu1 }
 0x721   :  { %v1577_v12 = vadd.f32 %v1677_v6, %v1576_v10 }
 0x722   :  { %1586 = vrot.lane.b32.xlu0 %v1582_v9, %s2660_s27 }
 0x794   :  { %v1587_v3 = vpop.permute.xlu0 %1586 }
 0x795   :  { %v1589_v13 = vsel %vm103_vm1, %v1577_v12, %v1587_v3 }
 0x796   :  { %v1591_v56 = vcombine.high %v1589_v13, %v1589_v13  ;;  %v1599_v22 = vmul.f32 %v1597_v14, %v1589_v13 }
 0x798   :  { %v1600_v37 = vmul.f32 %v1597_v14, %v1591_v56  ;;  %v1602_v15 = vsel %vm1601_vm3, %v1599_v22, 0.0 }
 0x799   :  { %v1603_v17 = vrot.slane %v1602_v15, 4 }
 0x79a   :  { %v1609_v21 = vsel %vm1601_vm3, %v1600_v37, 0.0 }
 0x79b   :  { %v1604_v24 = vadd.f32 %v1603_v17, %v1602_v15  ;;  %v1610_v30 = vrot.slane %v1609_v21, 4 }
 0x79d   :  { %v1605_v32 = vrot.slane %v1604_v24, 2  ;;  %v1611_v41 = vadd.f32 %v1610_v30, %v1609_v21 }
 0x79f   :  { %v1606_v43 = vadd.f32 %v1605_v32, %v1604_v24  ;;  %v1612_v46 = vrot.slane %v1611_v41, 2 }
 0x7a1   :  { %v1607_v53 = vrot.slane %v1606_v43, 1  ;;  %v1613_v54 = vadd.f32 %v1612_v46, %v1611_v41 }
 0x7a3   :  { %v1608_v62 = vadd.f32 %v1607_v53, %v1606_v43  ;;  %v1614_v63 = vrot.slane %v1613_v54, 1 }
 0x7a5   :  { %v1615_v18 = vadd.f32 %v1614_v63, %v1613_v54  ;;  %v1626_v2 = vadd.f32 %v1624_v57, %v1608_v62 }
 0x7a7   :  { %v1627_v7 = vadd.f32 %v1624_v57, %v1615_v18  ;;  %v1628_v8 = vmax.f32 %v1626_v2, 0.0 }
 0x7a9   :  { %v1629_v11 = vmax.f32 %v1627_v7, 0.0 }
 0x7ab   :  { %v1633_v19 = vsel %vm1632_vm4, %v1629_v11, %v1628_v8 }
 0x7ac   :  { %1636 = vst.msk [vmem:[#allocation9] sm:$0x3] %vm1635_vm5, %v1633_v19 }
 0x7ad   :  { %2634 = shalt.err (!%p2631_p0)
}
 0x7ae   :  { %s2635_s25 = scalar_lea.hbm %s3154_s14, 32 }
 0x7af   :  { %p2636_p1 = scmp.ne.s32.totalorder %s3154_s14, %s2635_s25  ;;  %p2639_p2 = scmp.lt.u32.totalorder %s2635_s25, %s3154_s14 }
 0x7b1   :  { %p2641_p3 = pnand %p2639_p2, %p2636_p1 }
 0x7b3   :  { %2644 = shalt.err (!%p2641_p3)
}
 0x7b4   :  { %1646 = dma.vmem_to_hbm [thread:$0]  %s1644_s24, 32, %s3154_s14, [#allocation5]  }
 0x7b5   :  { %2649 = dma.done.wait [#allocation5], 32  }
 0x7b6   :  { %2650 = vsyncadd [#allocation5], 4294967264 }
 0x7b7   :  { %1650 = vsyncpa [#allocation4], 1 }
 0x7b8   :  { %1651 = vsyncpa [#allocation7], 1 }
 0x7b9   :  { %1652 = vsyncpa [#allocation5], 1 }

</bundles_post_ra>
